<compile_context>
chip_gen: v5e
topology: v5e:2x2
jax: 0.10.0
libtpu: 0.0.40
codegen_flags: <defaults>
</compile_context>

<pallas_src>
import numpy as np
import jax
import jax.numpy as jnp
from jax.experimental import pallas as pl
from jax.experimental.pallas import tpu as pltpu

NEG_SLOPE = 0.05  # nn.LeakyReLU(negative_slope=0.05)


# --------------------------------------------------------------------------
# One-time parameter / constant preparation (all per-call layout ops removed
# from the forward path).
# --------------------------------------------------------------------------
def _fft_filter_matrix(L, n_fft, keep_frac):
    # TODO(synk): FilterBank.FFTFilter source was not provided; this is the same
    # FFT-domain low-pass surrogate as before, expressed exactly as its (L, L)
    # LTI operator so it can run inside the Pallas kernel as a matmul.
    k = np.arange(n_fft)
    cutoff = max(1, int(n_fft * keep_frac) // 2)
    mask = (np.minimum(k, n_fft - k) <= cutoff).astype(np.float64)
    eye = np.eye(L, dtype=np.float64)
    X = np.fft.fft(eye, n=n_fft, axis=0)
    Y = np.fft.ifft(X * mask[:, None], axis=0)[:L]
    return np.real(Y).astype(np.float32)          # y = M @ x


def _sel_pool_matrix(W):
    """[s_even | s_odd] selector for a stride-2 pair-max along lanes (floor mode)."""
    Wh = W // 2
    S = np.zeros((W, 2 * Wh), np.float32)
    d = np.arange(Wh)
    S[2 * d, d] = 1.0
    S[2 * d + 1, Wh + d] = 1.0
    return S


def _conv_w_mat(w):
    # PyTorch (Cout, Cin, KH, KW) -> (Cout, KH*KW*Cin); column order matches the
    # (kh, kw, cin) im2col row order built inside the kernel.
    Cout, Cin, KH, KW = w.shape
    return jnp.transpose(w, (0, 2, 3, 1)).reshape(Cout, KH * KW * Cin)


def prepare_params(p, L):
    """One-time layout of weights, filter-bank matrices and pool selectors."""
    fms = [_fft_filter_matrix(L, 256, 0.50),
           _fft_filter_matrix(L, 512, 0.25),
           _fft_filter_matrix(L, 1024, 0.125)]
    fmt = jnp.asarray(np.concatenate([m.T for m in fms], axis=1))   # (L, 3L)

    # conv1 (7,1), pad (3,0) on a 3-row image: the 3 output rows use tap windows
    # [3:6], [2:5], [1:4] against the SAME (3, L) RHS -> stack into one weight.
    w1 = p["w1"]                                                     # (32,1,7,1)
    w1all = jnp.concatenate([w1[:, 0, 3:6, 0],
                             w1[:, 0, 2:5, 0],
                             w1[:, 0, 1:4, 0]], axis=0)              # (96, 3)
    b1all = jnp.tile(p["b1"], 3).reshape(96, 1)                      # (96, 1)

    W2 = L // 2               # width after conv2 pool
    W3o = W2 + 1              # conv3 output width (pad 1, k 2)
    W4 = W3o // 2             # width after conv3 pool

    return (
        fmt,
        w1all, b1all,
        _conv_w_mat(p["w2"]), p["b2"].reshape(-1, 1),
        _conv_w_mat(p["w3"]), p["b3"].reshape(-1, 1),
        _conv_w_mat(p["w4"]), p["b4"].reshape(-1, 1),
        jnp.asarray(_sel_pool_matrix(L)),        # pool after conv2
        jnp.asarray(_sel_pool_matrix(W3o)),      # pool after conv3
        jnp.asarray(_sel_pool_matrix(W4)),       # pool after conv4
        p["wf1"].T, p["bf1"].reshape(1, -1),
        p["wf2"].T, p["bf2"].reshape(1, -1),
        p["wf3"].T, p["bf3"].reshape(1, -1),
    )


# --------------------------------------------------------------------------
# Fused kernel: filter bank + conv1..4 (+bias +LeakyReLU +pools) + tanh MLP.
# --------------------------------------------------------------------------
def _fused_kernel(x_ref, fmt_ref,
                  w1_ref, b1_ref, w2_ref, b2_ref, w3_ref, b3_ref,
                  w4_ref, b4_ref,
                  sel2_ref, sel3_ref, sel4_ref,
                  wf1_ref, bf1_ref, wf2_ref, bf2_ref, wf3_ref, bf3_ref,
                  o_ref):
    f32 = jnp.float32

    def leaky(y):
        return jnp.maximum(y, NEG_SLOPE * y)     # valid since 0 < slope < 1

    def pool_cols2(y, sel_ref):
        """Stride-2 pair-max along lanes: one selection matmul, max the halves."""
        wh = sel_ref.shape[1] // 2
        z = jnp.dot(y, sel_ref[...], preferred_element_type=f32)
        return jnp.maximum(z[:, :wh], z[:, wh:])

    def im2col(rows, h, KH, KW, Wout):
        parts = [rows[h + kh][:, kw:kw + Wout]
                 for kh in range(KH) for kw in range(KW)]
        return parts[0] if len(parts) == 1 else jnp.concatenate(parts, axis=0)

    # ---- FFT filter bank (precomputed LTI operators): raw x -> (3, L)
    x = x_ref[0]                                                    # (1, L)
    L = x.shape[1]
    r = jnp.dot(x, fmt_ref[...], preferred_element_type=f32)       # (1, 3L)
    a = jnp.concatenate([r[:, 0:L], r[:, L:2 * L], r[:, 2 * L:3 * L]], axis=0)

    # ---- conv1 (7x1, pad 3x0) + LeakyReLU + mpool1 ((2,1) stride (1,1))
    # all 3 output rows in one matmul: (96,3)@(3,L)
    y1 = leaky(jnp.dot(w1_ref[...], a, preferred_element_type=f32) + b1_ref[...])
    r0 = jnp.maximum(y1[0:32], y1[32:64])                           # (32, L)
    r1 = jnp.maximum(y1[32:64], y1[64:96])                          # (32, L)

    # ---- conv2 (3x3, pad 1x1) + LeakyReLU + mpool2 (2,2)
    zc = jnp.zeros((32, 1), f32)
    p0 = jnp.concatenate([zc, r0, zc], axis=1)                      # (32, L+2)
    p1 = jnp.concatenate([zc, r1, zc], axis=1)
    zr = jnp.zeros((32, L + 2), f32)
    rows_p = [zr, p0, p1, zr]
    patch = jnp.concatenate([im2col(rows_p, 0, 3, 3, L),
                             im2col(rows_p, 1, 3, 3, L)], axis=1)   # (288, 2L)
    y2 = leaky(jnp.dot(w2_ref[...], patch, preferred_element_type=f32) + b2_ref[...])
    a2 = pool_cols2(jnp.maximum(y2[:, :L], y2[:, L:]), sel2_ref)    # (16, L//2)
    W2 = a2.shape[1]

    # ---- conv3 (2x2, pad 1x1) + LeakyReLU + mpool2 (2,2)
    zc = jnp.zeros((16, 1), f32)
    pp = jnp.concatenate([zc, a2, zc], axis=1)                      # (16, W2+2)
    zr = jnp.zeros((16, W2 + 2), f32)
    rows_p = [zr, pp, zr]
    W3o = W2 + 1
    patch = jnp.concatenate([im2col(rows_p, 0, 2, 2, W3o),
                             im2col(rows_p, 1, 2, 2, W3o)], axis=1)  # (64, 2*W3o)
    y3 = leaky(jnp.dot(w3_ref[...], patch, preferred_element_type=f32) + b3_ref[...])
    a3 = pool_cols2(jnp.maximum(y3[:, :W3o], y3[:, W3o:]), sel3_ref)  # (4, W3o//2)
    W4 = a3.shape[1]

    # ---- conv4 (2x1, pad 1x0) + LeakyReLU + mpool2 (2,2)
    zr = jnp.zeros((4, W4), f32)
    rows_p = [zr, a3, zr]
    patch = jnp.concatenate([im2col(rows_p, 0, 2, 1, W4),
                             im2col(rows_p, 1, 2, 1, W4)], axis=1)   # (8, 2*W4)
    y4 = leaky(jnp.dot(w4_ref[...], patch, preferred_element_type=f32) + b4_ref[...])
    a4 = pool_cols2(jnp.maximum(y4[:, :W4], y4[:, W4:]), sel4_ref)   # (1, feat)

    # ---- MLP head: tanh(fc1) -> tanh(fc2) -> fc3
    h = jnp.tanh(jnp.dot(a4, wf1_ref[...], preferred_element_type=f32) + bf1_ref[...])
    h = jnp.tanh(jnp.dot(h, wf2_ref[...], preferred_element_type=f32) + bf2_ref[...])
    o_ref[0] = jnp.dot(h, wf3_ref[...], preferred_element_type=f32) + bf3_ref[...]


# --------------------------------------------------------------------------
# Wrapper: one pallas_call covers the whole forward; grid over the batch.
# --------------------------------------------------------------------------
def amc_forward(x_batch, prepped):
    """x_batch: (B, L) raw signals -> (B, 3). Per-sample semantics == torch forward."""
    B, L = x_batch.shape
    weights = prepped                      # 18 pre-laid-out arrays (see prepare_params)

    def full_spec(a):
        nd = a.ndim
        return pl.BlockSpec(a.shape, lambda b, _nd=nd: (0,) * _nd)

    x3d = x_batch.reshape(B, 1, L)         # free reshape; keeps last-2 dims == full dims
    out = pl.pallas_call(
        _fused_kernel,
        out_shape=jax.ShapeDtypeStruct((B, 1, 3), jnp.float32),
        grid=(B,),
        in_specs=[pl.BlockSpec((1, 1, L), lambda b: (b, 0, 0))]
                 + [full_spec(w) for w in weights],
        out_specs=pl.BlockSpec((1, 1, 3), lambda b: (b, 0, 0)),
        compiler_params=pltpu.CompilerParams(
            dimension_semantics=("parallel",)),   # both TCs on v7x; harmless elsewhere
    )(x3d, *weights)
    return out.reshape(B, 3)


def init_params(key, feat_dim):
    ks = jax.random.split(key, 14)

    def nrm(k, shape, scale):
        return scale * jax.random.normal(k, shape, dtype=jnp.float32)

    return {
        "w1": nrm(ks[0], (32, 1, 7, 1), 0.2), "b1": nrm(ks[1], (32,), 0.1),
        "w2": nrm(ks[2], (16, 32, 3, 3), 0.1), "b2": nrm(ks[3], (16,), 0.1),
        "w3": nrm(ks[4], (4, 16, 2, 2), 0.1), "b3": nrm(ks[5], (4,), 0.1),
        "w4": nrm(ks[6], (1, 4, 2, 1), 0.1), "b4": nrm(ks[7], (1,), 0.1),
        "wf1": nrm(ks[8], (128, feat_dim), 0.1), "bf1": nrm(ks[9], (128,), 0.05),
        "wf2": nrm(ks[10], (64, 128), 0.1), "bf2": nrm(ks[11], (64,), 0.05),
        "wf3": nrm(ks[12], (3, 64), 0.1), "bf3": nrm(ks[13], (3,), 0.05),
    }


if __name__ == "__main__":
    L = 128   # small synthetic signal length
    B = 4     # batch of independent signals (grid axis; per-sample == torch module)
    # flattened feature size implied by the conv/pool pipeline (LazyLinear in_features)
    feat_dim = (((L // 2) + 1) // 2) // 2            # = 16 for L = 128

    key = jax.random.PRNGKey(0)
    kx, kp = jax.random.split(key)
    x = jax.random.normal(kx, (B, L), dtype=jnp.float32)
    params = init_params(kp, feat_dim)
    prepped = prepare_params(params, L)              # one-time layout work

    fwd = jax.jit(amc_forward)
    out = jax.block_until_ready(fwd(x, prepped))

    assert out.shape == (B, 3), out.shape
    assert bool(jnp.all(jnp.isfinite(out)))
    print("KERNEL_OK")
</pallas_src>

<mosaic_0001>
module attributes {stable_mosaic.version = 11 : i64} {
  func.func @_fused_kernel(%arg0: i32, %arg1: memref<1x1x128xf32, #tpu.memory_space<vmem>>, %arg2: memref<128x384xf32, #tpu.memory_space<vmem>>, %arg3: memref<96x3xf32, #tpu.memory_space<vmem>>, %arg4: memref<96x1xf32, #tpu.memory_space<vmem>>, %arg5: memref<16x288xf32, #tpu.memory_space<vmem>>, %arg6: memref<16x1xf32, #tpu.memory_space<vmem>>, %arg7: memref<4x64xf32, #tpu.memory_space<vmem>>, %arg8: memref<4x1xf32, #tpu.memory_space<vmem>>, %arg9: memref<1x8xf32, #tpu.memory_space<vmem>>, %arg10: memref<1x1xf32, #tpu.memory_space<vmem>>, %arg11: memref<128x128xf32, #tpu.memory_space<vmem>>, %arg12: memref<65x64xf32, #tpu.memory_space<vmem>>, %arg13: memref<32x32xf32, #tpu.memory_space<vmem>>, %arg14: memref<16x128xf32, #tpu.memory_space<vmem>>, %arg15: memref<1x128xf32, #tpu.memory_space<vmem>>, %arg16: memref<128x64xf32, #tpu.memory_space<vmem>>, %arg17: memref<1x64xf32, #tpu.memory_space<vmem>>, %arg18: memref<64x3xf32, #tpu.memory_space<vmem>>, %arg19: memref<1x3xf32, #tpu.memory_space<vmem>>, %arg20: memref<1x1x3xf32, #tpu.memory_space<vmem>>) attributes {dimension_semantics = [#tpu.dimension_semantics<parallel>], iteration_bounds = array<i64: 4>, scalar_prefetch = 0 : i64, scratch_operands = 0 : i64, tpu.core_type = #tpu.core_type<tc>, window_params = [{transform_indices = @transform_0, window_bounds = array<i64: 1, 1, 128>}, {pipeline_mode = #tpu.pipeline_mode<synchronous>, transform_indices = @transform_1, window_bounds = array<i64: 128, 384>}, {pipeline_mode = #tpu.pipeline_mode<synchronous>, transform_indices = @transform_2, window_bounds = array<i64: 96, 3>}, {pipeline_mode = #tpu.pipeline_mode<synchronous>, transform_indices = @transform_3, window_bounds = array<i64: 96, 1>}, {pipeline_mode = #tpu.pipeline_mode<synchronous>, transform_indices = @transform_4, window_bounds = array<i64: 16, 288>}, {pipeline_mode = #tpu.pipeline_mode<synchronous>, transform_indices = @transform_5, window_bounds = array<i64: 16, 1>}, {pipeline_mode = #tpu.pipeline_mode<synchronous>, transform_indices = @transform_6, window_bounds = array<i64: 4, 64>}, {pipeline_mode = #tpu.pipeline_mode<synchronous>, transform_indices = @transform_7, window_bounds = array<i64: 4, 1>}, {pipeline_mode = #tpu.pipeline_mode<synchronous>, transform_indices = @transform_8, window_bounds = array<i64: 1, 8>}, {pipeline_mode = #tpu.pipeline_mode<synchronous>, transform_indices = @transform_9, window_bounds = array<i64: 1, 1>}, {pipeline_mode = #tpu.pipeline_mode<synchronous>, transform_indices = @transform_10, window_bounds = array<i64: 128, 128>}, {pipeline_mode = #tpu.pipeline_mode<synchronous>, transform_indices = @transform_11, window_bounds = array<i64: 65, 64>}, {pipeline_mode = #tpu.pipeline_mode<synchronous>, transform_indices = @transform_12, window_bounds = array<i64: 32, 32>}, {pipeline_mode = #tpu.pipeline_mode<synchronous>, transform_indices = @transform_13, window_bounds = array<i64: 16, 128>}, {pipeline_mode = #tpu.pipeline_mode<synchronous>, transform_indices = @transform_14, window_bounds = array<i64: 1, 128>}, {pipeline_mode = #tpu.pipeline_mode<synchronous>, transform_indices = @transform_15, window_bounds = array<i64: 128, 64>}, {pipeline_mode = #tpu.pipeline_mode<synchronous>, transform_indices = @transform_16, window_bounds = array<i64: 1, 64>}, {pipeline_mode = #tpu.pipeline_mode<synchronous>, transform_indices = @transform_17, window_bounds = array<i64: 64, 3>}, {pipeline_mode = #tpu.pipeline_mode<synchronous>, transform_indices = @transform_18, window_bounds = array<i64: 1, 3>}, {transform_indices = @transform_19, window_bounds = array<i64: 1, 1, 3>}]} {
    %c0 = arith.constant 0 : index
    %c0_0 = arith.constant 0 : index
    %c0_1 = arith.constant 0 : index
    %0 = vector.load %arg1[%c0, %c0_0, %c0_1] : memref<1x1x128xf32, #tpu.memory_space<vmem>>, vector<1x1x128xf32>
    %1 = vector.shape_cast %0 : vector<1x1x128xf32> to vector<1x128xf32>
    %c0_2 = arith.constant 0 : index
    %c0_3 = arith.constant 0 : index
    %2 = vector.load %arg2[%c0_2, %c0_3] : memref<128x384xf32, #tpu.memory_space<vmem>>, vector<128x384xf32>
    %cst = arith.constant dense<0.000000e+00> : vector<1x384xf32>
    %3 = tpu.matmul %1, %2, %cst {dimension_numbers = #tpu.dot_dimension_numbers<[1], [0], [0], [1], [0, 0, 1, 1], [], []>} : vector<1x128xf32>, vector<128x384xf32>, vector<1x384xf32> -> vector<1x384xf32>
    %4 = vector.extract_strided_slice %3 {offsets = [0, 0], sizes = [1, 128], strides = [1, 1]} : vector<1x384xf32> to vector<1x128xf32>
    %5 = vector.extract_strided_slice %3 {offsets = [0, 128], sizes = [1, 128], strides = [1, 1]} : vector<1x384xf32> to vector<1x128xf32>
    %6 = vector.extract_strided_slice %3 {offsets = [0, 256], sizes = [1, 128], strides = [1, 1]} : vector<1x384xf32> to vector<1x128xf32>
    %7 = tpu.concatenate %4, %5, %6 in 0 : vector<1x128xf32>, vector<1x128xf32>, vector<1x128xf32> -> vector<3x128xf32>
    %c0_4 = arith.constant 0 : index
    %c0_5 = arith.constant 0 : index
    %8 = vector.load %arg3[%c0_4, %c0_5] : memref<96x3xf32, #tpu.memory_space<vmem>>, vector<96x3xf32>
    %cst_6 = arith.constant dense<0.000000e+00> : vector<96x128xf32>
    %9 = tpu.matmul %8, %7, %cst_6 {dimension_numbers = #tpu.dot_dimension_numbers<[1], [0], [0], [1], [0, 0, 1, 1], [], []>} : vector<96x3xf32>, vector<3x128xf32>, vector<96x128xf32> -> vector<96x128xf32>
    %c0_7 = arith.constant 0 : index
    %c0_8 = arith.constant 0 : index
    %10 = vector.load %arg4[%c0_7, %c0_8] : memref<96x1xf32, #tpu.memory_space<vmem>>, vector<96x1xf32>
    %11 = vector.broadcast %10 : vector<96x1xf32> to vector<96x128xf32>
    %12 = arith.addf %9, %11 : vector<96x128xf32>
    %cst_9 = arith.constant 5.000000e-02 : f32
    %13 = vector.broadcast %cst_9 : f32 to vector<96x128xf32>
    %14 = arith.mulf %13, %12 : vector<96x128xf32>
    %15 = arith.maximumf %12, %14 : vector<96x128xf32>
    %16 = vector.extract_strided_slice %15 {offsets = [0, 0], sizes = [32, 128], strides = [1, 1]} : vector<96x128xf32> to vector<32x128xf32>
    %17 = vector.extract_strided_slice %15 {offsets = [32, 0], sizes = [32, 128], strides = [1, 1]} : vector<96x128xf32> to vector<32x128xf32>
    %18 = arith.maximumf %16, %17 : vector<32x128xf32>
    %19 = vector.extract_strided_slice %15 {offsets = [32, 0], sizes = [32, 128], strides = [1, 1]} : vector<96x128xf32> to vector<32x128xf32>
    %20 = vector.extract_strided_slice %15 {offsets = [64, 0], sizes = [32, 128], strides = [1, 1]} : vector<96x128xf32> to vector<32x128xf32>
    %21 = arith.maximumf %19, %20 : vector<32x128xf32>
    %cst_10 = arith.constant 0.000000e+00 : f32
    %22 = vector.broadcast %cst_10 : f32 to vector<32x1xf32>
    %23 = tpu.concatenate %22, %18, %22 in 1 : vector<32x1xf32>, vector<32x128xf32>, vector<32x1xf32> -> vector<32x130xf32>
    %24 = tpu.concatenate %22, %21, %22 in 1 : vector<32x1xf32>, vector<32x128xf32>, vector<32x1xf32> -> vector<32x130xf32>
    %cst_11 = arith.constant 0.000000e+00 : f32
    %25 = vector.broadcast %cst_11 : f32 to vector<32x130xf32>
    %26 = vector.extract_strided_slice %25 {offsets = [0, 0], sizes = [32, 128], strides = [1, 1]} : vector<32x130xf32> to vector<32x128xf32>
    %27 = vector.extract_strided_slice %25 {offsets = [0, 1], sizes = [32, 128], strides = [1, 1]} : vector<32x130xf32> to vector<32x128xf32>
    %28 = vector.extract_strided_slice %25 {offsets = [0, 2], sizes = [32, 128], strides = [1, 1]} : vector<32x130xf32> to vector<32x128xf32>
    %29 = vector.extract_strided_slice %23 {offsets = [0, 0], sizes = [32, 128], strides = [1, 1]} : vector<32x130xf32> to vector<32x128xf32>
    %30 = vector.extract_strided_slice %23 {offsets = [0, 1], sizes = [32, 128], strides = [1, 1]} : vector<32x130xf32> to vector<32x128xf32>
    %31 = vector.extract_strided_slice %23 {offsets = [0, 2], sizes = [32, 128], strides = [1, 1]} : vector<32x130xf32> to vector<32x128xf32>
    %32 = vector.extract_strided_slice %24 {offsets = [0, 0], sizes = [32, 128], strides = [1, 1]} : vector<32x130xf32> to vector<32x128xf32>
    %33 = vector.extract_strided_slice %24 {offsets = [0, 1], sizes = [32, 128], strides = [1, 1]} : vector<32x130xf32> to vector<32x128xf32>
    %34 = vector.extract_strided_slice %24 {offsets = [0, 2], sizes = [32, 128], strides = [1, 1]} : vector<32x130xf32> to vector<32x128xf32>
    %35 = tpu.concatenate %26, %27, %28, %29, %30, %31, %32, %33, %34 in 0 : vector<32x128xf32>, vector<32x128xf32>, vector<32x128xf32>, vector<32x128xf32>, vector<32x128xf32>, vector<32x128xf32>, vector<32x128xf32>, vector<32x128xf32>, vector<32x128xf32> -> vector<288x128xf32>
    %36 = vector.extract_strided_slice %23 {offsets = [0, 0], sizes = [32, 128], strides = [1, 1]} : vector<32x130xf32> to vector<32x128xf32>
    %37 = vector.extract_strided_slice %23 {offsets = [0, 1], sizes = [32, 128], strides = [1, 1]} : vector<32x130xf32> to vector<32x128xf32>
    %38 = vector.extract_strided_slice %23 {offsets = [0, 2], sizes = [32, 128], strides = [1, 1]} : vector<32x130xf32> to vector<32x128xf32>
    %39 = vector.extract_strided_slice %24 {offsets = [0, 0], sizes = [32, 128], strides = [1, 1]} : vector<32x130xf32> to vector<32x128xf32>
    %40 = vector.extract_strided_slice %24 {offsets = [0, 1], sizes = [32, 128], strides = [1, 1]} : vector<32x130xf32> to vector<32x128xf32>
    %41 = vector.extract_strided_slice %24 {offsets = [0, 2], sizes = [32, 128], strides = [1, 1]} : vector<32x130xf32> to vector<32x128xf32>
    %42 = vector.extract_strided_slice %25 {offsets = [0, 0], sizes = [32, 128], strides = [1, 1]} : vector<32x130xf32> to vector<32x128xf32>
    %43 = vector.extract_strided_slice %25 {offsets = [0, 1], sizes = [32, 128], strides = [1, 1]} : vector<32x130xf32> to vector<32x128xf32>
    %44 = vector.extract_strided_slice %25 {offsets = [0, 2], sizes = [32, 128], strides = [1, 1]} : vector<32x130xf32> to vector<32x128xf32>
    %45 = tpu.concatenate %36, %37, %38, %39, %40, %41, %42, %43, %44 in 0 : vector<32x128xf32>, vector<32x128xf32>, vector<32x128xf32>, vector<32x128xf32>, vector<32x128xf32>, vector<32x128xf32>, vector<32x128xf32>, vector<32x128xf32>, vector<32x128xf32> -> vector<288x128xf32>
    %46 = tpu.concatenate %35, %45 in 1 : vector<288x128xf32>, vector<288x128xf32> -> vector<288x256xf32>
    %c0_12 = arith.constant 0 : index
    %c0_13 = arith.constant 0 : index
    %47 = vector.load %arg5[%c0_12, %c0_13] : memref<16x288xf32, #tpu.memory_space<vmem>>, vector<16x288xf32>
    %cst_14 = arith.constant dense<0.000000e+00> : vector<16x256xf32>
    %48 = tpu.matmul %47, %46, %cst_14 {dimension_numbers = #tpu.dot_dimension_numbers<[1], [0], [0], [1], [0, 0, 1, 1], [], []>} : vector<16x288xf32>, vector<288x256xf32>, vector<16x256xf32> -> vector<16x256xf32>
    %c0_15 = arith.constant 0 : index
    %c0_16 = arith.constant 0 : index
    %49 = vector.load %arg6[%c0_15, %c0_16] : memref<16x1xf32, #tpu.memory_space<vmem>>, vector<16x1xf32>
    %50 = vector.broadcast %49 : vector<16x1xf32> to vector<16x256xf32>
    %51 = arith.addf %48, %50 : vector<16x256xf32>
    %cst_17 = arith.constant 5.000000e-02 : f32
    %52 = vector.broadcast %cst_17 : f32 to vector<16x256xf32>
    %53 = arith.mulf %52, %51 : vector<16x256xf32>
    %54 = arith.maximumf %51, %53 : vector<16x256xf32>
    %55 = vector.extract_strided_slice %54 {offsets = [0, 0], sizes = [16, 128], strides = [1, 1]} : vector<16x256xf32> to vector<16x128xf32>
    %56 = vector.extract_strided_slice %54 {offsets = [0, 128], sizes = [16, 128], strides = [1, 1]} : vector<16x256xf32> to vector<16x128xf32>
    %57 = arith.maximumf %55, %56 : vector<16x128xf32>
    %c0_18 = arith.constant 0 : index
    %c0_19 = arith.constant 0 : index
    %58 = vector.load %arg11[%c0_18, %c0_19] : memref<128x128xf32, #tpu.memory_space<vmem>>, vector<128x128xf32>
    %cst_20 = arith.constant dense<0.000000e+00> : vector<16x128xf32>
    %59 = tpu.matmul %57, %58, %cst_20 {dimension_numbers = #tpu.dot_dimension_numbers<[1], [0], [0], [1], [0, 0, 1, 1], [], []>} : vector<16x128xf32>, vector<128x128xf32>, vector<16x128xf32> -> vector<16x128xf32>
    %60 = vector.extract_strided_slice %59 {offsets = [0, 0], sizes = [16, 64], strides = [1, 1]} : vector<16x128xf32> to vector<16x64xf32>
    %61 = vector.extract_strided_slice %59 {offsets = [0, 64], sizes = [16, 64], strides = [1, 1]} : vector<16x128xf32> to vector<16x64xf32>
    %62 = arith.maximumf %60, %61 : vector<16x64xf32>
    %cst_21 = arith.constant 0.000000e+00 : f32
    %63 = vector.broadcast %cst_21 : f32 to vector<16x1xf32>
    %64 = tpu.concatenate %63, %62, %63 in 1 : vector<16x1xf32>, vector<16x64xf32>, vector<16x1xf32> -> vector<16x66xf32>
    %cst_22 = arith.constant 0.000000e+00 : f32
    %65 = vector.broadcast %cst_22 : f32 to vector<16x66xf32>
    %66 = vector.extract_strided_slice %65 {offsets = [0, 0], sizes = [16, 65], strides = [1, 1]} : vector<16x66xf32> to vector<16x65xf32>
    %67 = vector.extract_strided_slice %65 {offsets = [0, 1], sizes = [16, 65], strides = [1, 1]} : vector<16x66xf32> to vector<16x65xf32>
    %68 = vector.extract_strided_slice %64 {offsets = [0, 0], sizes = [16, 65], strides = [1, 1]} : vector<16x66xf32> to vector<16x65xf32>
    %69 = vector.extract_strided_slice %64 {offsets = [0, 1], sizes = [16, 65], strides = [1, 1]} : vector<16x66xf32> to vector<16x65xf32>
    %70 = tpu.concatenate %66, %67, %68, %69 in 0 : vector<16x65xf32>, vector<16x65xf32>, vector<16x65xf32>, vector<16x65xf32> -> vector<64x65xf32>
    %71 = vector.extract_strided_slice %64 {offsets = [0, 0], sizes = [16, 65], strides = [1, 1]} : vector<16x66xf32> to vector<16x65xf32>
    %72 = vector.extract_strided_slice %64 {offsets = [0, 1], sizes = [16, 65], strides = [1, 1]} : vector<16x66xf32> to vector<16x65xf32>
    %73 = vector.extract_strided_slice %65 {offsets = [0, 0], sizes = [16, 65], strides = [1, 1]} : vector<16x66xf32> to vector<16x65xf32>
    %74 = vector.extract_strided_slice %65 {offsets = [0, 1], sizes = [16, 65], strides = [1, 1]} : vector<16x66xf32> to vector<16x65xf32>
    %75 = tpu.concatenate %71, %72, %73, %74 in 0 : vector<16x65xf32>, vector<16x65xf32>, vector<16x65xf32>, vector<16x65xf32> -> vector<64x65xf32>
    %76 = tpu.concatenate %70, %75 in 1 : vector<64x65xf32>, vector<64x65xf32> -> vector<64x130xf32>
    %c0_23 = arith.constant 0 : index
    %c0_24 = arith.constant 0 : index
    %77 = vector.load %arg7[%c0_23, %c0_24] : memref<4x64xf32, #tpu.memory_space<vmem>>, vector<4x64xf32>
    %cst_25 = arith.constant dense<0.000000e+00> : vector<4x130xf32>
    %78 = tpu.matmul %77, %76, %cst_25 {dimension_numbers = #tpu.dot_dimension_numbers<[1], [0], [0], [1], [0, 0, 1, 1], [], []>} : vector<4x64xf32>, vector<64x130xf32>, vector<4x130xf32> -> vector<4x130xf32>
    %c0_26 = arith.constant 0 : index
    %c0_27 = arith.constant 0 : index
    %79 = vector.load %arg8[%c0_26, %c0_27] : memref<4x1xf32, #tpu.memory_space<vmem>>, vector<4x1xf32>
    %80 = vector.broadcast %79 : vector<4x1xf32> to vector<4x130xf32>
    %81 = arith.addf %78, %80 : vector<4x130xf32>
    %cst_28 = arith.constant 5.000000e-02 : f32
    %82 = vector.broadcast %cst_28 : f32 to vector<4x130xf32>
    %83 = arith.mulf %82, %81 : vector<4x130xf32>
    %84 = arith.maximumf %81, %83 : vector<4x130xf32>
    %85 = vector.extract_strided_slice %84 {offsets = [0, 0], sizes = [4, 65], strides = [1, 1]} : vector<4x130xf32> to vector<4x65xf32>
    %86 = vector.extract_strided_slice %84 {offsets = [0, 65], sizes = [4, 65], strides = [1, 1]} : vector<4x130xf32> to vector<4x65xf32>
    %87 = arith.maximumf %85, %86 : vector<4x65xf32>
    %c0_29 = arith.constant 0 : index
    %c0_30 = arith.constant 0 : index
    %88 = vector.load %arg12[%c0_29, %c0_30] : memref<65x64xf32, #tpu.memory_space<vmem>>, vector<65x64xf32>
    %cst_31 = arith.constant dense<0.000000e+00> : vector<4x64xf32>
    %89 = tpu.matmul %87, %88, %cst_31 {dimension_numbers = #tpu.dot_dimension_numbers<[1], [0], [0], [1], [0, 0, 1, 1], [], []>} : vector<4x65xf32>, vector<65x64xf32>, vector<4x64xf32> -> vector<4x64xf32>
    %90 = vector.extract_strided_slice %89 {offsets = [0, 0], sizes = [4, 32], strides = [1, 1]} : vector<4x64xf32> to vector<4x32xf32>
    %91 = vector.extract_strided_slice %89 {offsets = [0, 32], sizes = [4, 32], strides = [1, 1]} : vector<4x64xf32> to vector<4x32xf32>
    %92 = arith.maximumf %90, %91 : vector<4x32xf32>
    %cst_32 = arith.constant 0.000000e+00 : f32
    %93 = vector.broadcast %cst_32 : f32 to vector<4x32xf32>
    %94 = tpu.concatenate %93, %92 in 0 : vector<4x32xf32>, vector<4x32xf32> -> vector<8x32xf32>
    %95 = tpu.concatenate %92, %93 in 0 : vector<4x32xf32>, vector<4x32xf32> -> vector<8x32xf32>
    %96 = tpu.concatenate %94, %95 in 1 : vector<8x32xf32>, vector<8x32xf32> -> vector<8x64xf32>
    %c0_33 = arith.constant 0 : index
    %c0_34 = arith.constant 0 : index
    %97 = vector.load %arg9[%c0_33, %c0_34] : memref<1x8xf32, #tpu.memory_space<vmem>>, vector<1x8xf32>
    %cst_35 = arith.constant dense<0.000000e+00> : vector<1x64xf32>
    %98 = tpu.matmul %97, %96, %cst_35 {dimension_numbers = #tpu.dot_dimension_numbers<[1], [0], [0], [1], [0, 0, 1, 1], [], []>} : vector<1x8xf32>, vector<8x64xf32>, vector<1x64xf32> -> vector<1x64xf32>
    %c0_36 = arith.constant 0 : index
    %c0_37 = arith.constant 0 : index
    %99 = vector.load %arg10[%c0_36, %c0_37] : memref<1x1xf32, #tpu.memory_space<vmem>>, vector<1x1xf32>
    %100 = vector.broadcast %99 : vector<1x1xf32> to vector<1x64xf32>
    %101 = arith.addf %98, %100 : vector<1x64xf32>
    %cst_38 = arith.constant 5.000000e-02 : f32
    %102 = vector.broadcast %cst_38 : f32 to vector<1x64xf32>
    %103 = arith.mulf %102, %101 : vector<1x64xf32>
    %104 = arith.maximumf %101, %103 : vector<1x64xf32>
    %105 = vector.extract_strided_slice %104 {offsets = [0, 0], sizes = [1, 32], strides = [1, 1]} : vector<1x64xf32> to vector<1x32xf32>
    %106 = vector.extract_strided_slice %104 {offsets = [0, 32], sizes = [1, 32], strides = [1, 1]} : vector<1x64xf32> to vector<1x32xf32>
    %107 = arith.maximumf %105, %106 : vector<1x32xf32>
    %c0_39 = arith.constant 0 : index
    %c0_40 = arith.constant 0 : index
    %108 = vector.load %arg13[%c0_39, %c0_40] : memref<32x32xf32, #tpu.memory_space<vmem>>, vector<32x32xf32>
    %cst_41 = arith.constant dense<0.000000e+00> : vector<1x32xf32>
    %109 = tpu.matmul %107, %108, %cst_41 {dimension_numbers = #tpu.dot_dimension_numbers<[1], [0], [0], [1], [0, 0, 1, 1], [], []>} : vector<1x32xf32>, vector<32x32xf32>, vector<1x32xf32> -> vector<1x32xf32>
    %110 = vector.extract_strided_slice %109 {offsets = [0, 0], sizes = [1, 16], strides = [1, 1]} : vector<1x32xf32> to vector<1x16xf32>
    %111 = vector.extract_strided_slice %109 {offsets = [0, 16], sizes = [1, 16], strides = [1, 1]} : vector<1x32xf32> to vector<1x16xf32>
    %112 = arith.maximumf %110, %111 : vector<1x16xf32>
    %c0_42 = arith.constant 0 : index
    %c0_43 = arith.constant 0 : index
    %113 = vector.load %arg14[%c0_42, %c0_43] : memref<16x128xf32, #tpu.memory_space<vmem>>, vector<16x128xf32>
    %cst_44 = arith.constant dense<0.000000e+00> : vector<1x128xf32>
    %114 = tpu.matmul %112, %113, %cst_44 {dimension_numbers = #tpu.dot_dimension_numbers<[1], [0], [0], [1], [0, 0, 1, 1], [], []>} : vector<1x16xf32>, vector<16x128xf32>, vector<1x128xf32> -> vector<1x128xf32>
    %c0_45 = arith.constant 0 : index
    %c0_46 = arith.constant 0 : index
    %115 = vector.load %arg15[%c0_45, %c0_46] : memref<1x128xf32, #tpu.memory_space<vmem>>, vector<1x128xf32>
    %116 = arith.addf %114, %115 : vector<1x128xf32>
    %117 = math.tanh %116 : vector<1x128xf32>
    %c0_47 = arith.constant 0 : index
    %c0_48 = arith.constant 0 : index
    %118 = vector.load %arg16[%c0_47, %c0_48] : memref<128x64xf32, #tpu.memory_space<vmem>>, vector<128x64xf32>
    %cst_49 = arith.constant dense<0.000000e+00> : vector<1x64xf32>
    %119 = tpu.matmul %117, %118, %cst_49 {dimension_numbers = #tpu.dot_dimension_numbers<[1], [0], [0], [1], [0, 0, 1, 1], [], []>} : vector<1x128xf32>, vector<128x64xf32>, vector<1x64xf32> -> vector<1x64xf32>
    %c0_50 = arith.constant 0 : index
    %c0_51 = arith.constant 0 : index
    %120 = vector.load %arg17[%c0_50, %c0_51] : memref<1x64xf32, #tpu.memory_space<vmem>>, vector<1x64xf32>
    %121 = arith.addf %119, %120 : vector<1x64xf32>
    %122 = math.tanh %121 : vector<1x64xf32>
    %c0_52 = arith.constant 0 : index
    %c0_53 = arith.constant 0 : index
    %123 = vector.load %arg18[%c0_52, %c0_53] : memref<64x3xf32, #tpu.memory_space<vmem>>, vector<64x3xf32>
    %cst_54 = arith.constant dense<0.000000e+00> : vector<1x3xf32>
    %124 = tpu.matmul %122, %123, %cst_54 {dimension_numbers = #tpu.dot_dimension_numbers<[1], [0], [0], [1], [0, 0, 1, 1], [], []>} : vector<1x64xf32>, vector<64x3xf32>, vector<1x3xf32> -> vector<1x3xf32>
    %c0_55 = arith.constant 0 : index
    %c0_56 = arith.constant 0 : index
    %125 = vector.load %arg19[%c0_55, %c0_56] : memref<1x3xf32, #tpu.memory_space<vmem>>, vector<1x3xf32>
    %126 = arith.addf %124, %125 : vector<1x3xf32>
    %c0_57 = arith.constant 0 : index
    %c0_58 = arith.constant 0 : index
    %c0_59 = arith.constant 0 : index
    %127 = vector.load %arg20[%c0_57, %c0_58, %c0_59] : memref<1x1x3xf32, #tpu.memory_space<vmem>>, vector<1x1x3xf32>
    %128 = vector.shape_cast %127 : vector<1x1x3xf32> to vector<1x3xf32>
    %129 = vector.shape_cast %126 : vector<1x3xf32> to vector<1x1x3xf32>
    tpu.vector_store %arg20[%c0_57, %c0_58, %c0_59], %129 {strides = array<i32>} : memref<1x1x3xf32, #tpu.memory_space<vmem>>, vector<1x1x3xf32>,
    return
  }
  func.func @transform_0(%arg0: i32) -> (i32, i32, i32) {
    %c0_i32 = arith.constant 0 : i32
    %c0_i32_0 = arith.constant 0 : i32
    %c0_i32_1 = arith.constant 0 : i32
    return %arg0, %c0_i32, %c0_i32_0 : i32, i32, i32
  }
  func.func @transform_1(%arg0: i32) -> (i32, i32) {
    %c0_i32 = arith.constant 0 : i32
    %c0_i32_0 = arith.constant 0 : i32
    %c0_i32_1 = arith.constant 0 : i32
    return %c0_i32, %c0_i32_0 : i32, i32
  }
  func.func @transform_2(%arg0: i32) -> (i32, i32) {
    %c0_i32 = arith.constant 0 : i32
    %c0_i32_0 = arith.constant 0 : i32
    %c0_i32_1 = arith.constant 0 : i32
    return %c0_i32, %c0_i32_0 : i32, i32
  }
  func.func @transform_3(%arg0: i32) -> (i32, i32) {
    %c0_i32 = arith.constant 0 : i32
    %c0_i32_0 = arith.constant 0 : i32
    %c0_i32_1 = arith.constant 0 : i32
    return %c0_i32, %c0_i32_0 : i32, i32
  }
  func.func @transform_4(%arg0: i32) -> (i32, i32) {
    %c0_i32 = arith.constant 0 : i32
    %c0_i32_0 = arith.constant 0 : i32
    %c0_i32_1 = arith.constant 0 : i32
    return %c0_i32, %c0_i32_0 : i32, i32
  }
  func.func @transform_5(%arg0: i32) -> (i32, i32) {
    %c0_i32 = arith.constant 0 : i32
    %c0_i32_0 = arith.constant 0 : i32
    %c0_i32_1 = arith.constant 0 : i32
    return %c0_i32, %c0_i32_0 : i32, i32
  }
  func.func @transform_6(%arg0: i32) -> (i32, i32) {
    %c0_i32 = arith.constant 0 : i32
    %c0_i32_0 = arith.constant 0 : i32
    %c0_i32_1 = arith.constant 0 : i32
    return %c0_i32, %c0_i32_0 : i32, i32
  }
  func.func @transform_7(%arg0: i32) -> (i32, i32) {
    %c0_i32 = arith.constant 0 : i32
    %c0_i32_0 = arith.constant 0 : i32
    %c0_i32_1 = arith.constant 0 : i32
    return %c0_i32, %c0_i32_0 : i32, i32
  }
  func.func @transform_8(%arg0: i32) -> (i32, i32) {
    %c0_i32 = arith.constant 0 : i32
    %c0_i32_0 = arith.constant 0 : i32
    %c0_i32_1 = arith.constant 0 : i32
    return %c0_i32, %c0_i32_0 : i32, i32
  }
  func.func @transform_9(%arg0: i32) -> (i32, i32) {
    %c0_i32 = arith.constant 0 : i32
    %c0_i32_0 = arith.constant 0 : i32
    %c0_i32_1 = arith.constant 0 : i32
    return %c0_i32, %c0_i32_0 : i32, i32
  }
  func.func @transform_10(%arg0: i32) -> (i32, i32) {
    %c0_i32 = arith.constant 0 : i32
    %c0_i32_0 = arith.constant 0 : i32
    %c0_i32_1 = arith.constant 0 : i32
    return %c0_i32, %c0_i32_0 : i32, i32
  }
  func.func @transform_11(%arg0: i32) -> (i32, i32) {
    %c0_i32 = arith.constant 0 : i32
    %c0_i32_0 = arith.constant 0 : i32
    %c0_i32_1 = arith.constant 0 : i32
    return %c0_i32, %c0_i32_0 : i32, i32
  }
  func.func @transform_12(%arg0: i32) -> (i32, i32) {
    %c0_i32 = arith.constant 0 : i32
    %c0_i32_0 = arith.constant 0 : i32
    %c0_i32_1 = arith.constant 0 : i32
    return %c0_i32, %c0_i32_0 : i32, i32
  }
  func.func @transform_13(%arg0: i32) -> (i32, i32) {
    %c0_i32 = arith.constant 0 : i32
    %c0_i32_0 = arith.constant 0 : i32
    %c0_i32_1 = arith.constant 0 : i32
    return %c0_i32, %c0_i32_0 : i32, i32
  }
  func.func @transform_14(%arg0: i32) -> (i32, i32) {
    %c0_i32 = arith.constant 0 : i32
    %c0_i32_0 = arith.constant 0 : i32
    %c0_i32_1 = arith.constant 0 : i32
    return %c0_i32, %c0_i32_0 : i32, i32
  }
  func.func @transform_15(%arg0: i32) -> (i32, i32) {
    %c0_i32 = arith.constant 0 : i32
    %c0_i32_0 = arith.constant 0 : i32
    %c0_i32_1 = arith.constant 0 : i32
    return %c0_i32, %c0_i32_0 : i32, i32
  }
  func.func @transform_16(%arg0: i32) -> (i32, i32) {
    %c0_i32 = arith.constant 0 : i32
    %c0_i32_0 = arith.constant 0 : i32
    %c0_i32_1 = arith.constant 0 : i32
    return %c0_i32, %c0_i32_0 : i32, i32
  }
  func.func @transform_17(%arg0: i32) -> (i32, i32) {
    %c0_i32 = arith.constant 0 : i32
    %c0_i32_0 = arith.constant 0 : i32
    %c0_i32_1 = arith.constant 0 : i32
    return %c0_i32, %c0_i32_0 : i32, i32
  }
  func.func @transform_18(%arg0: i32) -> (i32, i32) {
    %c0_i32 = arith.constant 0 : i32
    %c0_i32_0 = arith.constant 0 : i32
    %c0_i32_1 = arith.constant 0 : i32
    return %c0_i32, %c0_i32_0 : i32, i32
  }
  func.func @transform_19(%arg0: i32) -> (i32, i32, i32) {
    %c0_i32 = arith.constant 0 : i32
    %c0_i32_0 = arith.constant 0 : i32
    %c0_i32_1 = arith.constant 0 : i32
    return %arg0, %c0_i32, %c0_i32_0 : i32, i32, i32
  }
}

</mosaic_0001>

<bundles_post_ra>
// kernel: amc_forward.1
= control target key start
LH: loop header
LB: loop body
LE: loop exit
PB: predicated region body
PF: predicated region fallthrough
CT: control target
= control target key end

     0   :  { %s2773_s0 = inlined_call_operand.vmem [shape: f32[4,1,128], index: 0, kind: input, shape index: {}]   ;;  %s2774_s1 = inlined_call_operand.hbm [shape: f32[128,384], index: 1, kind: input, shape index: {}]   ;;  %s2775_s2 = inlined_call_operand.vmem [shape: f32[96,3], index: 2, kind: input, shape index: {}]   ;;  %s2776_s3 = inlined_call_operand.vmem [shape: f32[96,1], index: 3, kind: input, shape index: {}]   ;;  %s2777_s4 = inlined_call_operand.vmem [shape: f32[16,288], index: 4, kind: input, shape index: {}]   ;;  %s2778_s5 = inlined_call_operand.vmem [shape: f32[16,1], index: 5, kind: input, shape index: {}]   ;;  %s2779_s6 = inlined_call_operand.vmem [shape: f32[4,64], index: 6, kind: input, shape index: {}]   ;;  %s2780_s7 = inlined_call_operand.vmem [shape: f32[4,1], index: 7, kind: input, shape index: {}]   ;;  %s2781_s8 = inlined_call_operand.vmem [shape: f32[1,8], index: 8, kind: input, shape index: {}]   ;;  %s2782_s9 = inlined_call_operand.<no memory space> [shape: f32[1,1], index: 9, kind: input, shape index: {}]   ;;  %s2783_s10 = inlined_call_operand.vmem [shape: f32[128,128], index: 10, kind: input, shape index: {}]   ;;  %s2784_s11 = inlined_call_operand.vmem [shape: f32[65,64], index: 11, kind: input, shape index: {}]   ;;  %s2785_s12 = inlined_call_operand.vmem [shape: f32[32,32], index: 12, kind: input, shape index: {}]   ;;  %s2786_s13 = inlined_call_operand.vmem [shape: f32[16,128], index: 13, kind: input, shape index: {}]   ;;  %s2787_s14 = inlined_call_operand.vmem [shape: f32[1,128], index: 14, kind: input, shape index: {}]   ;;  %s2788_s15 = inlined_call_operand.vmem [shape: f32[128,64], index: 15, kind: input, shape index: {}]   ;;  %s2789_s16 = inlined_call_operand.vmem [shape: f32[1,64], index: 16, kind: input, shape index: {}]   ;;  %s2790_s17 = inlined_call_operand.vmem [shape: f32[64,3], index: 17, kind: input, shape index: {}]   ;;  %s2791_s18 = inlined_call_operand.vmem [shape: f32[1,3], index: 18, kind: input, shape index: {}]   ;;  %s2792_s19 = inlined_call_operand.hbm [shape: f32[4,1,3], index: 19, kind: output, shape index: {}]  }
   0x1   :  { %2801 = sst [smem:[#allocation14_spill]] %s2773_s0  ;;  %v24_v0 = vstv %s2782_s9 }
   0x2   :  { %2802 = sst [smem:[#allocation15_spill]] %s2774_s1  ;;  %25 = vst [vmem:[#allocation2] sm:$0x1] %v24_v0 }
   0x3   :  { %2803 = sst [smem:[#allocation16_spill]] %s2775_s2 }
   0x4   :  { %2804 = sst [smem:[#allocation17_spill]] %s2776_s3 }
   0x5   :  { %2805 = sst [smem:[#allocation18_spill]] %s2777_s4 }
   0x6   :  { %26 = vsyncpa [#allocation4], 0 }
   0x7   :  { %27 = vsyncpa [#allocation5], 0 }
   0x8   :  { %29 = vsyncpa [#allocation5 + $0x1], 0  ;;  %s2174_s20 = smov 0   ;;  %s2176_s21 = smov 0  }
   0x9   :  { %s2178_s1 = smov 0   ;;  %s2180_s22 = smov 0  }
   0xa LB: > { %2806 = sst [smem:[#allocation9_spill]] %s2043_s20  ;;  %s2195_s9 = sadd.s32 4294967295, %s2055_s22   ;;  %s2055_s22 = sphi %s2180_s22, %s2822_s22   ;;  %s2051_s1 = sphi %s2178_s1, %s2824_s1   ;;  %s2047_s21 = sphi %s2176_s21, %s2826_s21   ;;  %s2043_s20 = sphi %s2174_s20, %s2825_s20  }
   0xb   : > { %2807 = sst [smem:[#allocation10_spill]] %s2051_s1  ;;  %s1736_s2 = sadd.s32 4294967294, %s2055_s22  }
   0xc   : > { %s2199_s23 = sadd.s32 1, %s2055_s22   ;;  %s446_s24 = sadd.s32 1, %s2051_s1 }
   0xd   : > { %2808 = sst [smem:[#allocation11_spill]] %s2199_s23  ;;  %s443_s25 = ssub.s32 %s2055_s22, %s2199_s23 }
   0xe   : > { %p456_p0 = scmp.ne.s32.totalorder %s2051_s1, %s2047_s21  ;;  %p444_p1 = scmp.eq.s32.totalorder %s443_s25, 0 }
   0xf   : > { %p457_p2 = scmp.eq.s32.totalorder %s2195_s9, 3  ;;  %p462_p3 = scmp.ne.s32.totalorder %s2047_s21, %s2043_s20 }
  0x10   : > { %p463_p4 = scmp.eq.s32.totalorder %s1736_s2, 3  ;;  %p1737_p7 = scmp.ge.s32.totalorder %s2055_s22, 1 }
  0x11   : > { %s2210_s3 = scalar_select %p444_p1, %s2051_s1, %s446_s24  }
  0x12   : > { %p2212_p5 = por %p457_p2, %p456_p0  ;;  %p2216_p6 = por %p463_p4, %p462_p3 }
  0x13   : > { %2809 = sst [smem:[#allocation12_spill]] %s2210_s3  ;;  %p470_p8 = scmp.lt.s32.totalorder %s2055_s22, 5 }
  0x14   : > { %s2811_s27 = scalar_select %p2216_p6, 1, 0 }
  0x15   : > { %p1823_p9 = scmp.eq.s32.totalorder %s2195_s9, 0  ;;  %p471_p10 = pnand %p1737_p7, %p470_p8 }
  0x16   : > { %2812 = sst [smem:[#allocation13_spill]] %s2811_s27  ;;  %s2057_s2 = smov [#allocation3]  }
  0x17   : > { %s2813_s0 = sld [smem:[#allocation15_spill]]  ;;  %p1815_p11 = pneg %p471_p10 }
  0x18   : > { %s483_s24 = sshll.u32 %s2057_s2, 4  ;;  %s2058_s25 = smov 384   ;;  %s484_s24 = int_to_ptr.vmem [resolvable:$true] %s483_s24 }
  0x19   : > { %p1816_p12 = pnand %p1823_p9, %p1815_p11  ;;  %s2059_s3 = smov 24  }
  0x1a   : > { %556 = sbr.rel (%p471_p10) target bundleno = 2918 (0xb66), region = 96 }
  0x1d   : > { %s481_s30 = sshll.u32 %s2813_s0, 4  ;;  %s482_s30 = int_to_ptr.hbm [resolvable:$true] %s481_s30 }
  0x1e   : > { %1818 = dma.hbm_to_vmem [thread:$0]  (!%p1816_p12), %s482_s30, 6144, %s484_s24, [#allocation4], %s2058_s25, %s2058_s25, %s2059_s3  }
  0x1f   : > { %2034 = dma.done.wait (%p1823_p9), [#allocation4], 6144  }
  0x20   : > { %2036 = vsyncadd (%p1823_p9), [#allocation4], 4294961152  ;;  %v661_v1 = vld [vmem:[#allocation3 + $0x178] sm:$0xff]  ;;  %v658_v2 = vld [vmem:[#allocation3 + $0x160] sm:$0xff]  ;;  %v2060_v10 = vmov 0   ;;  %s2814_s29 = sld [smem:[#allocation17_spill]]  ;;  %s1668_s27 = scalar_lea.hbm %s2792_s19, %s2195_s9 }
  0x21   : > { %702 = vmatpush.msra.mxu2 %v661_v1  ;;  %v660_v3 = vld [vmem:[#allocation3 + $0x170] sm:$0xff]  ;;  %v659_v4 = vld [vmem:[#allocation3 + $0x168] sm:$0xff]  ;;  %v657_v6 = vld [vmem:[#allocation3 + $0x158] sm:$0xff]  ;;  %1872 = vset.pattern.permute.xlu0 %v2060_v10  ;;  %p610_p13 = scmp.lt.s32.totalorder %s2195_s9, 3  ;;  %s2815_s24 = sld [smem:[#allocation14_spill]]  ;;  %vm728_vm0 = vcmask 1040384  }
  0x22   : > { %v655_v5 = vld [vmem:[#allocation3 + $0x148] sm:$0xff]  ;;  %682 = vmatpush.msra.mxu1 %v660_v3  ;;  %662 = vmatpush.msra.mxu0 %v659_v4  ;;  %v656_v7 = vld [vmem:[#allocation3 + $0x150] sm:$0xff]  ;;  %v654_v8 = vld [vmem:[#allocation3 + $0x140] sm:$0xff]  ;;  %vm730_vm1 = vcmask 1041408   ;;  %vm853_vm2 = vcmask 1042432   ;;  %vm816_vm3 = vcmask 23552  }
  0x23   : > { %703 = vmatpush.msra.mxu2 %v658_v2  ;;  %v653_v9 = vld [vmem:[#allocation3 + $0x138] sm:$0xff]  ;;  %v652_v11 = vld [vmem:[#allocation3 + $0x130] sm:$0xff]  ;;  %v651_v12 = vld [vmem:[#allocation3 + $0x128] sm:$0xff]  ;;  %1873 = vset.pattern.permute.xlu1 %v2060_v10  ;;  %s611_s0 = scalar_select %p610_p13, %s2195_s9, 3  ;;  %vm958_vm4 = vcmask 7168   ;;  %vm1015_vm6 = vcmask 1039360  }
  0x24   : > { %683 = vmatpush.msra.mxu1 %v657_v6  ;;  %663 = vmatpush.msra.mxu0 %v656_v7  ;;  %v650_v13 = vld [vmem:[#allocation3 + $0x120] sm:$0xff]  ;;  %v649_v14 = vld [vmem:[#allocation3 + $0x118] sm:$0xff]  ;;  %v648_v15 = vld [vmem:[#allocation3 + $0x110] sm:$0xff]  ;;  %s2061_s30 = smov 1   ;;  %s2062_s2 = smov 126   ;;  %vm1040_vm7 = vcmask 1031168  }
  0x25   : > { %704 = vmatpush.msra.mxu2 %v655_v5  ;;  %v647_v16 = vld [vmem:[#allocation3 + $0x108] sm:$0xff]  ;;  %1874 = vset.pattern.permute.xlu2 %v2060_v10  ;;  %v646_v17 = vld [vmem:[#allocation3 + $0x100] sm:$0xff]  ;;  %v645_v18 = vld [vmem:[#allocation3 + $0xf8] sm:$0xff]  ;;  %s2063_s1 = smov 127   ;;  %s2819_s4 = sld [smem:[#allocation18_spill]]  ;;  %vm1123_vm8 = vcmask 261120  }
  0x26   : > { %684 = vmatpush.msra.mxu1 %v654_v8  ;;  %664 = vmatpush.msra.mxu0 %v653_v9  ;;  %v644_v19 = vld [vmem:[#allocation3 + $0xf0] sm:$0xff]  ;;  %v643_v20 = vld [vmem:[#allocation3 + $0xe8] sm:$0xff]  ;;  %v642_v21 = vld [vmem:[#allocation3 + $0xe0] sm:$0xff]  ;;  %s2066_s23 = smov 65   ;;  %vm1337_vm9 = vcmask 531456   ;;  %vm1379_vm11 = vcmask 523264  }
  0x27   : > { %705 = vmatpush.msra.mxu2 %v652_v11  ;;  %v641_v22 = vld [vmem:[#allocation3 + $0xd8] sm:$0xff]  ;;  %v640_v23 = vld [vmem:[#allocation3 + $0xd0] sm:$0xff]  ;;  %v639_v24 = vld [vmem:[#allocation3 + $0xc8] sm:$0xff]  ;;  %s612_s25 = scalar_lea.vmem %s2815_s24, %s611_s0  ;;  %s2816_s0 = sld [smem:[#allocation16_spill]]  ;;  %vm1433_vm12 = vcmask 515072   ;;  %vm1480_vm13 = vcmask 1043456  }
  0x28   : > { %685 = vmatpush.msra.mxu1 %v651_v12  ;;  %665 = vmatpush.msra.mxu0 %v650_v13  ;;  %v638_v25 = vld [vmem:[#allocation3 + $0xc0] sm:$0xff]  ;;  %v637_v26 = vld [vmem:[#allocation3 + $0xb8] sm:$0xff]  ;;  %v636_v27 = vld [vmem:[#allocation3 + $0xb0] sm:$0xff]  ;;  %s2067_s28 = smov 63   ;;  %s2068_s3 = smov 96   ;;  %vm1496_vm14 = vcmask 64512  }
  0x29   : > { %706 = vmatpush.msra.mxu2 %v649_v14  ;;  %v635_v28 = vld [vmem:[#allocation3 + $0xa8] sm:$0xff]  ;;  %v634_v29 = vld [vmem:[#allocation3 + $0xa0] sm:$0xff]  ;;  %v747_v30 = vld [vmem:[%s2814_s29 + $0x18] sm:$0xff]  ;;  %vm1562_vm15 = vcmask 130048   ;;  %s2009_s20 = scalar_lea.hbm %s2792_s19, 4 }
  0x2a   : > { %686 = vmatpush.msra.mxu1 %v648_v15  ;;  %666 = vmatpush.msra.mxu0 %v647_v16  ;;  %v633_v31 = vld [vmem:[#allocation3 + $0x98] sm:$0xff]  ;;  %v632_v32 = vld [vmem:[#allocation3 + $0x90] sm:$0xff]  ;;  %v631_v33 = vld [vmem:[#allocation3 + $0x88] sm:$0xff] }
  0x2b   : > { %707 = vmatpush.msra.mxu2 %v646_v17  ;;  %773 = vperm.xlu0 %1872, %v747_v30   ;;  %v630_v34 = vld [vmem:[#allocation3 + $0x80] sm:$0xff]  ;;  %v629_v35 = vld [vmem:[#allocation3 + $0x78] sm:$0xff]  ;;  %v628_v36 = vld [vmem:[#allocation3 + $0x70] sm:$0xff] }
  0x2c   : > { %687 = vmatpush.msra.mxu1 %v645_v18  ;;  %667 = vmatpush.msra.mxu0 %v644_v19  ;;  %v627_v37 = vld [vmem:[#allocation3 + $0x68] sm:$0xff]  ;;  %v626_v38 = vld [vmem:[#allocation3 + $0x60] sm:$0xff]  ;;  %v625_v39 = vld [vmem:[#allocation3 + $0x58] sm:$0xff] }
  0x2d   : > { %708 = vmatpush.msra.mxu2 %v643_v20  ;;  %v624_v40 = vld [vmem:[#allocation3 + $0x50] sm:$0xff]  ;;  %v623_v41 = vld [vmem:[#allocation3 + $0x48] sm:$0xff]  ;;  %v622_v42 = vld [vmem:[#allocation3 + $0x40] sm:$0xff] }
  0x2e   : > { %688 = vmatpush.msra.mxu1 %v642_v21  ;;  %668 = vmatpush.msra.mxu0 %v641_v22  ;;  %v621_v43 = vld [vmem:[#allocation3 + $0x38] sm:$0xff]  ;;  %v620_v44 = vld [vmem:[#allocation3 + $0x30] sm:$0xff]  ;;  %v619_v45 = vld [vmem:[#allocation3 + $0x28] sm:$0xff] }
  0x2f   : > { %709 = vmatpush.msra.mxu2 %v640_v23  ;;  %v618_v46 = vld [vmem:[#allocation3 + $0x20] sm:$0xff]  ;;  %v617_v47 = vld [vmem:[#allocation3 + $0x18] sm:$0xff]  ;;  %v616_v48 = vld [vmem:[#allocation3 + $0x10] sm:$0xff] }
  0x30   : > { %689 = vmatpush.msra.mxu1 %v639_v24  ;;  %669 = vmatpush.msra.mxu0 %v638_v25  ;;  %v613_v49 = vld [vmem:[%s612_s25] sm:$0x1]  ;;  %v615_v50 = vld [vmem:[#allocation3 + $0x8] sm:$0xff]  ;;  %v614_v51 = vld [vmem:[#allocation3] sm:$0xff] }
  0x31   : > { %710 = vmatpush.msra.mxu2 %v637_v26  ;;  %v751_v52 = vld [vmem:[%s2814_s29 + $0x38] sm:$0xff]  ;;  %v745_v53 = vld [vmem:[%s2814_s29 + $0x8] sm:$0xff]  ;;  %v744_v54 = vld [vmem:[%s2814_s29] sm:$0xff] }
  0x32   : > { %690 = vmatpush.msra.mxu1 %v636_v27  ;;  %670 = vmatpush.msra.mxu0 %v635_v28  ;;  %v755_v58 = vld [vmem:[%s2814_s29 + $0x58] sm:$0xff]  ;;  %v732_v62 = vld [vmem:[%s2816_s0] sm:$0xff]  ;;  %v746_v0 = vld [vmem:[%s2814_s29 + $0x10] sm:$0xff] }
  0x33   : > { %711 = vmatpush.msra.mxu2 %v634_v29  ;;  %793 = vperm.xlu0 %1872, %v751_v52   ;;  %v733_v1 = vld [vmem:[%s2816_s0 + $0x8] sm:$0xff]  ;;  %v734_v3 = vld [vmem:[%s2816_s0 + $0x10] sm:$0xff]  ;;  %v748_v4 = vld [vmem:[%s2814_s29 + $0x20] sm:$0xff] }
  0x34   : > { %691 = vmatpush.msra.mxu1 %v633_v31  ;;  %671 = vmatpush.msra.mxu0 %v632_v32  ;;  %v749_v2 = vld [vmem:[%s2814_s29 + $0x28] sm:$0xff]  ;;  %v735_v5 = vld [vmem:[%s2816_s0 + $0x18] sm:$0xff]  ;;  %v736_v6 = vld [vmem:[%s2816_s0 + $0x20] sm:$0xff] }
  0x35   : > { %712 = vmatpush.msra.mxu2 %v631_v33  ;;  %813 = vperm.xlu1 %1873, %v755_v58   ;;  %v737_v7 = vld [vmem:[%s2816_s0 + $0x28] sm:$0xff]  ;;  %v738_v8 = vld [vmem:[%s2816_s0 + $0x30] sm:$0xff]  ;;  %v739_v10 = vld [vmem:[%s2816_s0 + $0x38] sm:$0xff] }
  0x36   : > { %692 = vmatpush.msra.mxu1 %v630_v34  ;;  %672 = vmatpush.msra.mxu0 %v629_v35  ;;  %v750_v9 = vld [vmem:[%s2814_s29 + $0x30] sm:$0xff]  ;;  %v740_v12 = vld [vmem:[%s2816_s0 + $0x40] sm:$0xff]  ;;  %v753_v13 = vld [vmem:[%s2814_s29 + $0x48] sm:$0xff] }
  0x37   : > { %713 = vmatpush.msra.mxu2 %v628_v36  ;;  %788 = vperm.xlu2 %1874, %v750_v9   ;;  %v754_v11 = vld [vmem:[%s2814_s29 + $0x50] sm:$0xff]  ;;  %v741_v14 = vld [vmem:[%s2816_s0 + $0x48] sm:$0xff]  ;;  %v752_v15 = vld [vmem:[%s2814_s29 + $0x40] sm:$0xff] }
  0x38   : > { %693 = vmatpush.msra.mxu1 %v627_v37  ;;  %673 = vmatpush.msra.mxu0 %v626_v38  ;;  %v742_v16 = vld [vmem:[%s2816_s0 + $0x50] sm:$0xff]  ;;  %v743_v17 = vld [vmem:[%s2816_s0 + $0x58] sm:$0xff]  ;;  %vm2341_vm5 = vmneg %vm958_vm4 }
  0x39   : > { %714 = vmatpush.msra.mxu2 %v625_v39  ;;  %vm1791_vm10 = vmneg %vm1337_vm9 }
  0x3a   : > { %694 = vmatpush.msra.mxu1 %v624_v40  ;;  %674 = vmatpush.msra.mxu0 %v623_v41 }
  0x3b   : > { %715 = vmatpush.msra.mxu2 %v622_v42  ;;  %763 = vperm.xlu0 %1872, %v745_v53  }
  0x3c   : > { %695 = vmatpush.msra.mxu1 %v621_v43  ;;  %675 = vmatpush.msra.mxu0 %v620_v44 }
  0x3d   : > { %716 = vmatpush.msra.mxu2 %v619_v45  ;;  %768 = vperm.xlu1 %1873, %v746_v0  }
  0x3e   : > { %696 = vmatpush.msra.mxu1 %v618_v46  ;;  %676 = vmatpush.msra.mxu0 %v617_v47 }
  0x3f   : > { %717 = vmatpush.msra.mxu2 %v616_v48  ;;  %808 = vperm.xlu2 %1874, %v754_v11  }
  0x40   : > { %718 = vmatmul.f32.vlgmr.msra.gmra.mxu2 %v613_v49  ;;  %697 = vmatpush.msra.mxu1 %v615_v50 }
  0x41   : > { %698 = vmatmul.f32.vlgmr.msra.gmra.mxu1 %v613_v49  ;;  %677 = vmatpush.msra.mxu0 %v614_v51 }
  0x42   : > { %678 = vmatmul.f32.vlgmr.msra.gmra.mxu0 %v613_v49 }
  0x43   : > { %758 = vperm.xlu0 %1872, %v744_v54  }
  0x45   : > { %783 = vperm.xlu1 %1873, %v749_v2  }
  0x47   : > { %803 = vperm.xlu2 %1874, %v753_v13  }
  0x4d   : > { %778 = vperm.xlu1 %1873, %v748_v4  }
  0x4f   : > { %798 = vperm.xlu2 %1874, %v752_v15  }
  0x91   : > { %v789_v38 = vpop.permute.xlu2 %788 }
  0x99   : > { %v809_v53 = vpop.permute.xlu2 %808 }
  0x9d   : > { %v774_v20 = vpop.permute.xlu0 %773 }
  0xa5   : > { %v794_v24 = vpop.permute.xlu0 %793 }
  0xa7   : > { %v814_v22 = vpop.permute.xlu1 %813 }
  0xad   : > { %v764_v27 = vpop.permute.xlu0 %763 }
  0xaf   : > { %v769_v25 = vpop.permute.xlu1 %768 }
  0xb7   : > { %v784_v29 = vpop.permute.xlu1 %783 }
  0xbe   : > { %v699_v55 = vpop.f32.mrf.mxu1 }
  0xbf   : > { %v723_v56 = vrot.slane %v699_v55, 7  ;;  %v679_v57 = vpop.f32.mrf.mxu0 }
  0xc1   : > { %v729_v60 = vsel %vm728_vm0, %v679_v57, %v723_v56  ;;  %v804_v56 = vpop.permute.xlu2 %803 }
  0xc3   : > { %v719_v59 = vpop.f32.mrf.mxu2 }
  0xc4   : > { %v726_v61 = vrot.slane %v719_v59, 6 }
  0xc6   : > { %v731_v63 = vsel %vm730_vm1, %v729_v60, %v726_v61 }
  0xc7   : > { %1742 = vmatpush.msk.msra.mxu3 %vm853_vm2, %v731_v63 }
  0xc8   : > { %1743 = vmatmul.msk.f32.vlgmr.msra.gmra.mxu3 %vm816_vm3, %v732_v62  ;;  %v779_v62 = vpop.permute.xlu1 %778 }
  0xd0   : > { %1744 = vmatmul.msk.f32.gmra.mxu3 %vm816_vm3, %v733_v1  ;;  %v759_v1 = vpop.permute.xlu0 %758 }
  0xd8   : > { %1745 = vmatmul.msk.f32.gmra.mxu3 %vm816_vm3, %v734_v3 }
  0xe0   : > { %1746 = vmatmul.msk.f32.gmra.mxu3 %vm816_vm3, %v735_v5 }
  0xe8   : > { %1747 = vmatmul.msk.f32.gmra.mxu3 %vm816_vm3, %v736_v6 }
  0xf0   : > { %1748 = vmatmul.msk.f32.gmra.mxu3 %vm816_vm3, %v737_v7 }
  0xf8   : > { %1749 = vmatmul.msk.f32.gmra.mxu3 %vm816_vm3, %v738_v8  ;;  %v799_v8 = vpop.permute.xlu2 %798 }
 0x100   : > { %1750 = vmatmul.msk.f32.gmra.mxu3 %vm816_vm3, %v739_v10 }
 0x108   : > { %1751 = vmatmul.msk.f32.gmra.mxu3 %vm816_vm3, %v740_v12 }
 0x110   : > { %1752 = vmatmul.msk.f32.gmra.mxu3 %vm816_vm3, %v741_v14 }
 0x118   : > { %1753 = vmatmul.msk.f32.gmra.mxu3 %vm816_vm3, %v742_v16 }
 0x120   : > { %1754 = vmatmul.msk.f32.gmra.mxu3 %vm816_vm3, %v743_v17 }
 0x14b   : > { %v874_v18 = vpop.f32.mrf.mxu3 }
 0x14c   : > { %v875_v4 = vadd.f32 %v874_v18, %v759_v1 }
 0x14e   : > { %v910_v10 = vmul.f32 0.05, %v875_v4 }
 0x150   : > { %v922_v15 = vmax.f32 %v875_v4, %v910_v10 }
 0x153   : > { %v877_v19 = vpop.f32.mrf.mxu3 }
 0x154   : > { %v878_v28 = vadd.f32 %v877_v19, %v764_v27  ;;  %v1282_v27 = vld [vmem:[%s2783_s10 + $0x20] sm:$0xff] }
 0x156   : > { %v911_v31 = vmul.f32 0.05, %v878_v28 }
 0x158   : > { %v923_v34 = vmax.f32 %v878_v28, %v911_v31 }
 0x15b   : > { %v880_v21 = vpop.f32.mrf.mxu3 }
 0x15c   : > { %v881_v35 = vadd.f32 %v880_v21, %v769_v25 }
 0x15e   : > { %v912_v40 = vmul.f32 0.05, %v881_v35 }
 0x160   : > { %v924_v43 = vmax.f32 %v881_v35, %v912_v40 }
 0x163   : > { %v883_v23 = vpop.f32.mrf.mxu3 }
 0x164   : > { %v884_v44 = vadd.f32 %v883_v23, %v774_v20 }
 0x166   : > { %v913_v48 = vmul.f32 0.05, %v884_v44 }
 0x168   : > { %v925_v51 = vmax.f32 %v884_v44, %v913_v48 }
 0x16b   : > { %v886_v26 = vpop.f32.mrf.mxu3 }
 0x16c   : > { %v887_v2 = vadd.f32 %v886_v26, %v779_v62 }
 0x16e   : > { %v914_v6 = vmul.f32 0.05, %v887_v2 }
 0x170   : > { %v926_v12 = vmax.f32 %v887_v2, %v914_v6 }
 0x172   : > { %v934_v20 = vmax.f32 %v922_v15, %v926_v12 }
 0x173   : > { %v889_v30 = vpop.f32.mrf.mxu3 }
 0x174   : > { %v890_v32 = vadd.f32 %v889_v30, %v784_v29 }
 0x176   : > { %v915_v33 = vmul.f32 0.05, %v890_v32 }
 0x178   : > { %v927_v36 = vmax.f32 %v890_v32, %v915_v33 }
 0x17a   : > { %v935_v37 = vmax.f32 %v923_v34, %v927_v36 }
 0x17b   : > { %v892_v39 = vpop.f32.mrf.mxu3 }
 0x17c   : > { %v893_v41 = vadd.f32 %v892_v39, %v789_v38  ;;  %948 = vrot.lane.b32.xlu1 %v935_v37, %s2061_s30 }
 0x17e   : > { %v916_v42 = vmul.f32 0.05, %v893_v41 }
 0x180   : > { %v928_v45 = vmax.f32 %v893_v41, %v916_v42  ;;  %v2064_v42 = vmov 0.0  }
 0x182   : > { %v936_v46 = vmax.f32 %v924_v43, %v928_v45 }
 0x183   : > { %v895_v47 = vpop.f32.mrf.mxu3 }
 0x184   : > { %v896_v49 = vadd.f32 %v895_v47, %v794_v24  ;;  %950 = vrot.lane.b32.xlu2 %v936_v46, %s2061_s30 }
 0x186   : > { %v917_v50 = vmul.f32 0.05, %v896_v49 }
 0x188   : > { %v929_v52 = vmax.f32 %v896_v49, %v917_v50 }
 0x18a   : > { %v937_v54 = vmax.f32 %v925_v51, %v929_v52 }
 0x18b   : > { %v898_v55 = vpop.f32.mrf.mxu3 }
 0x18c   : > { %952 = vrot.lane.b32.xlu0 %v937_v54, %s2061_s30  ;;  %v899_v13 = vadd.f32 %v898_v55, %v799_v8 }
 0x18e   : > { %v918_v17 = vmul.f32 0.05, %v899_v13 }
 0x190   : > { %v930_v18 = vmax.f32 %v899_v13, %v918_v17 }
 0x192   : > { %v938_v21 = vmax.f32 %v926_v12, %v930_v18 }
 0x193   : > { %v901_v57 = vpop.f32.mrf.mxu3 }
 0x194   : > { %v902_v58 = vadd.f32 %v901_v57, %v804_v56  ;;  %v1112_v56 = vld [vmem:[%s2778_s5 + $0x8] sm:$0xff]  ;;  %v1111_v57 = vld [vmem:[%s2778_s5] sm:$0xff] }
 0x196   : > { %v919_v59 = vmul.f32 0.05, %v902_v58 }
 0x198   : > { %v931_v60 = vmax.f32 %v902_v58, %v919_v59  ;;  %v2436_v59 = vld [vmem:[%s2819_s4 + $0x18] sm:$0xff] }
 0x19a   : > { %v939_v61 = vmax.f32 %v927_v36, %v931_v60 }
 0x19b   : > { %v904_v63 = vpop.f32.mrf.mxu3 }
 0x19c   : > { %v905_v0 = vadd.f32 %v904_v63, %v809_v53  ;;  %973 = vrot.lane.b32.xlu2 %v939_v61, %s2061_s30  ;;  %v2418_v53 = vld [vmem:[%s2819_s4] sm:$0xff] }
 0x19e   : > { %v920_v3 = vmul.f32 0.05, %v905_v0 }
 0x1a0   : > { %v932_v5 = vmax.f32 %v905_v0, %v920_v3 }
 0x1a2   : > { %v940_v7 = vmax.f32 %v928_v45, %v932_v5 }
 0x1a3   : > { %v907_v9 = vpop.f32.mrf.mxu3 }
 0x1a4   : > { %v908_v11 = vadd.f32 %v907_v9, %v814_v22  ;;  %975 = vrot.lane.b32.xlu0 %v940_v7, %s2061_s30 }
 0x1a6   : > { %v921_v14 = vmul.f32 0.05, %v908_v11 }
 0x1a8   : > { %v933_v16 = vmax.f32 %v908_v11, %v921_v14 }
 0x1aa   : > { %v941_v19 = vmax.f32 %v929_v52, %v933_v16 }
 0x1ac   : > { %977 = vrot.lane.b32.xlu1 %v941_v19, %s2061_s30  ;;  %946 = vrot.lane.b32.xlu0 %v934_v20, %s2061_s30 }
 0x1b4   : > { %971 = vrot.lane.b32.xlu1 %v938_v21, %s2061_s30 }
 0x1de   : > { %v2330_v23 = vpop.permute.xlu2 %950 }
 0x1df   : > { %v961_v50 = vsel %vm958_vm4, 0.0, %v2330_v23  ;;  %v965_v51 = vsel %vm958_vm4, %v2330_v23, 0.0 }
 0x1e0   : > { %v1940_v52 = vpack.i.bf16 %v965_v51, %v961_v50 }
 0x1ee   : > { %v2353_v29 = vpop.permute.xlu1 %948 }
 0x1ef   : > { %v960_v44 = vsel %vm958_vm4, 0.0, %v2353_v29  ;;  %v964_v45 = vsel %vm958_vm4, %v2353_v29, 0.0 }
 0x1f0   : > { %v1880_v49 = vpack.i.bf16 %v964_v45, %v960_v44 }
 0x1f6   : > { %v2332_v22 = vpop.permute.xlu2 %973 }
 0x1f7   : > { %v984_v24 = vsel %vm958_vm4, 0.0, %v2332_v22  ;;  %v988_v25 = vsel %vm958_vm4, %v2332_v22, 0.0 }
 0x1f8   : > { %v1900_v26 = vpack.i.bf16 %v988_v25, %v984_v24 }
 0x1fa   : > { %1901 = vrot.lane.b32.xlu1 %v1900_v26, %s2062_s2  ;;  %1896 = vrot.lane.b32.xlu0 %v1900_v26, %s2063_s1 }
 0x1fe   : > { %v2345_v28 = vpop.permute.xlu0 %952 }
 0x1ff   : > { %1756 = vmatpush.msk.msrb.mxu0 %vm2341_vm5, %v2345_v28  ;;  %v962_v54 = vsel %vm958_vm4, 0.0, %v2345_v28  ;;  %v966_v55 = vsel %vm958_vm4, %v2345_v28, 0.0 }
 0x200   : > { %v1890_v58 = vpack.i.bf16 %v966_v55, %v962_v54 }
 0x201   : > { %1758 = vmatpush.msk.msrb.mxu0 %vm2341_vm5, %v2330_v23 }
 0x203   : > { %1760 = vmatpush.msk.msrb.mxu0 %vm2341_vm5, %v2353_v29 }
 0x216   : > { %v2358_v30 = vpop.permute.xlu0 %975 }
 0x217   : > { %v985_v31 = vsel %vm958_vm4, 0.0, %v2358_v30  ;;  %v989_v32 = vsel %vm958_vm4, %v2358_v30, 0.0 }
 0x218   : > { %v1910_v33 = vpack.i.bf16 %v989_v32, %v985_v31 }
 0x21a   : > { %1911 = vrot.lane.b32.xlu1 %v1910_v33, %s2062_s2  ;;  %1906 = vrot.lane.b32.xlu0 %v1910_v33, %s2063_s1 }
 0x21e   : > { %v2366_v34 = vpop.permute.xlu1 %977  ;;  %v2368_v35 = vpop.permute.xlu0 %946 }
 0x21f   : > { %1762 = vmatpush.msk.msrb.mxu0 %vm2341_vm5, %v2368_v35  ;;  %v986_v36 = vsel %vm958_vm4, 0.0, %v2366_v34  ;;  %v990_v37 = vsel %vm958_vm4, %v2366_v34, 0.0  ;;  %v959_v38 = vsel %vm958_vm4, 0.0, %v2368_v35  ;;  %v963_v39 = vsel %vm958_vm4, %v2368_v35, 0.0 }
 0x220   : > { %v1925_v40 = vpack.i.bf16 %v990_v37, %v986_v36  ;;  %v1875_v41 = vpack.i.bf16 %v963_v39, %v959_v38 }
 0x221   : > { %1134 = vmatpush.msrb.mxu0 %v2064_v42 }
 0x222   : > { %1926 = vrot.lane.b32.xlu1 %v1925_v40, %s2062_s2  ;;  %1916 = vrot.lane.b32.xlu0 %v1925_v40, %s2063_s1  ;;  %v2458_v40 = vld [vmem:[%s2819_s4 + $0x10] sm:$0xff] }
 0x223   : > { %1876 = vrot.lane.b32.xlu2 %v1875_v41, %s2062_s2  ;;  %1135 = vmatpush.msrb.mxu0 %v2064_v42 }
 0x225   : > { %1136 = vmatpush.msrb.mxu0 %v2064_v42 }
 0x226   : > { %v2387_v43 = vpop.permute.xlu1 %971 }
 0x227   : > { %1137 = vmatpush.msrb.mxu0 %v2064_v42  ;;  %v983_v46 = vsel %vm958_vm4, 0.0, %v2387_v43  ;;  %v987_v47 = vsel %vm958_vm4, %v2387_v43, 0.0 }
 0x228   : > { %v1930_v48 = vpack.i.bf16 %v987_v47, %v983_v46 }
 0x229   : > { %1138 = vmatpush.msrb.mxu0 %v2064_v42 }
 0x22a   : > { %1931 = vrot.lane.b32.xlu1 %v1930_v48, %s2062_s2  ;;  %1921 = vrot.lane.b32.xlu0 %v1930_v48, %s2063_s1 }
 0x22b   : > { %1881 = vrot.lane.b32.xlu2 %v1880_v49, %s2062_s2  ;;  %1139 = vmatpush.msrb.mxu0 %v2064_v42 }
 0x22d   : > { %1140 = vmatpush.msrb.mxu0 %v2064_v42 }
 0x22f   : > { %1141 = vmatpush.msrb.mxu0 %v2064_v42 }
 0x231   : > { %1142 = vmatpush.msrb.mxu0 %v2064_v42 }
 0x232   : > { %1946 = vrot.lane.b32.xlu1 %v1880_v49, %s2063_s1  ;;  %1941 = vrot.lane.b32.xlu0 %v1940_v52, %s2063_s1  ;;  %v1106_v49 = vld [vmem:[%s2819_s4 + $0x8] sm:$0xff] }
 0x233   : > { %1886 = vrot.lane.b32.xlu2 %v1940_v52, %s2062_s2  ;;  %1143 = vmatpush.msrb.mxu0 %v2064_v42 }
 0x235   : > { %1144 = vmatpush.msrb.mxu0 %v2064_v42 }
 0x237   : > { %1145 = vmatpush.msrb.mxu0 %v2064_v42 }
 0x238   : > { %1146 = vmatmul.f32.vlgmr.msrb.gmra.mxu0 %v2418_v53 }
 0x23a   : > { %1120 = vperm.xlu1 %1873, %v1112_v56   ;;  %1115 = vperm.xlu0 %1872, %v1111_v57  }
 0x23b   : > { %1891 = vrot.lane.b32.xlu2 %v1890_v58, %s2062_s2  ;;  %s2065_s2 = smov 64  }
 0x240   : > { %1149 = vmatmul.f32.gmra.mxu0 %v2436_v59 }
 0x243   : > { %1936 = vrot.lane.b32.xlu2 %v1890_v58, %s2063_s1  ;;  %v1292_v58 = vld [vmem:[%s2783_s10 + $0x70] sm:$0xff] }
 0x24b   : > { %1951 = vrot.lane.b32.xlu2 %v1875_v41, %s2063_s1 }
 0x26c   : > { %v1902_v61 = vpop.permute.xlu1 %1901  ;;  %v1897_v62 = vpop.permute.xlu0 %1896 }
 0x26d   : > { %v1904_v13 = vunpack.i.h.bf16 %v1902_v61  ;;  %v1903_v14 = vunpack.i.l.bf16 %v1902_v61  ;;  %v1899_v15 = vunpack.i.h.bf16 %v1897_v62  ;;  %v1898_v16 = vunpack.i.l.bf16 %v1897_v62 }
 0x26f   : > { %v1098_v24 = vsel %vm1040_vm7, %v1903_v14, %v1904_v13  ;;  %v1074_v25 = vsel %vm1015_vm6, %v1898_v16, %v1899_v15  ;;  %v1287_v14 = vld [vmem:[%s2783_s10 + $0x48] sm:$0xff]  ;;  %v1286_v15 = vld [vmem:[%s2783_s10 + $0x40] sm:$0xff]  ;;  %v1285_v16 = vld [vmem:[%s2783_s10 + $0x38] sm:$0xff] }
 0x27d   : > { %v2441_v60 = vpop.permute.xlu2 %1876 }
 0x27e   : > { %v1879_v50 = vunpack.i.h.bf16 %v2441_v60  ;;  %v1878_v51 = vunpack.i.l.bf16 %v2441_v60 }
 0x285   : > { %v2443_v63 = vpop.permute.xlu2 %1881 }
 0x286   : > { %v1884_v47 = vunpack.i.h.bf16 %v2443_v63  ;;  %v1883_v48 = vunpack.i.l.bf16 %v2443_v63  ;;  %v1041_v63 = vsel %vm1040_vm7, %v1878_v51, %v1879_v50 }
 0x288   : > { %v1042_v57 = vsel %vm1040_vm7, %v1883_v48, %v1884_v47 }
 0x28c   : > { %v1912_v0 = vpop.permute.xlu1 %1911  ;;  %v1907_v1 = vpop.permute.xlu0 %1906 }
 0x28d   : > { %v2445_v2 = vpop.permute.xlu2 %1886  ;;  %v1914_v3 = vunpack.i.h.bf16 %v1912_v0  ;;  %v1913_v4 = vunpack.i.l.bf16 %v1912_v0  ;;  %v1909_v5 = vunpack.i.h.bf16 %v1907_v1  ;;  %v1908_v6 = vunpack.i.l.bf16 %v1907_v1  ;;  %v1291_v0 = vld [vmem:[%s2783_s10 + $0x68] sm:$0xff] }
 0x28e   : > { %v1888_v46 = vunpack.i.l.bf16 %v2445_v2 }
 0x28f   : > { %v1075_v20 = vsel %vm1015_vm6, %v1908_v6, %v1909_v5  ;;  %v1099_v18 = vsel %vm1040_vm7, %v1913_v4, %v1914_v3  ;;  %v1109_v5 = vld [vmem:[%s2819_s4 + $0x20] sm:$0xff] }
 0x290   : > { %v1290_v6 = vld [vmem:[%s2783_s10 + $0x60] sm:$0xff] }
 0x294   : > { %v1927_v7 = vpop.permute.xlu1 %1926  ;;  %v1917_v8 = vpop.permute.xlu0 %1916 }
 0x295   : > { %v1929_v9 = vunpack.i.h.bf16 %v1927_v7  ;;  %v1928_v10 = vunpack.i.l.bf16 %v1927_v7  ;;  %v1919_v11 = vunpack.i.h.bf16 %v1917_v8  ;;  %v1918_v12 = vunpack.i.l.bf16 %v1917_v8  ;;  %v1892_v21 = vpop.permute.xlu2 %1891 }
 0x296   : > { %v1894_v41 = vunpack.i.h.bf16 %v1892_v21  ;;  %v1893_v44 = vunpack.i.l.bf16 %v1892_v21 }
 0x297   : > { %v1076_v17 = vsel %vm1015_vm6, %v1918_v12, %v1919_v11  ;;  %v1100_v19 = vsel %vm1040_vm7, %v1928_v10, %v1929_v9  ;;  %v1289_v10 = vld [vmem:[%s2783_s10 + $0x58] sm:$0xff]  ;;  %v1288_v12 = vld [vmem:[%s2783_s10 + $0x50] sm:$0xff] }
 0x298   : > { %1153 = vmatpush.msrb.mxu1 %v1076_v17  ;;  %1188 = vmatpush.msrb.mxu2 %v1100_v19 }
 0x299   : > { %1230 = vmatpush.msra.mxu0 %v1100_v19 }
 0x29a   : > { %1154 = vmatpush.msrb.mxu1 %v1075_v20  ;;  %1189 = vmatpush.msrb.mxu2 %v1099_v18 }
 0x29b   : > { %1231 = vmatpush.msra.mxu0 %v1099_v18  ;;  %v1278_v18 = vld [vmem:[%s2783_s10] sm:$0xff] }
 0x29c   : > { %v1932_v26 = vpop.permute.xlu1 %1931  ;;  %1190 = vmatpush.msrb.mxu2 %v1098_v24  ;;  %v1922_v31 = vpop.permute.xlu0 %1921  ;;  %1155 = vmatpush.msrb.mxu1 %v1074_v25 }
 0x29d   : > { %v1934_v32 = vunpack.i.h.bf16 %v1932_v26  ;;  %v1933_v33 = vunpack.i.l.bf16 %v1932_v26  ;;  %1232 = vmatpush.msra.mxu0 %v1098_v24  ;;  %v1924_v36 = vunpack.i.h.bf16 %v1922_v31  ;;  %v1923_v37 = vunpack.i.l.bf16 %v1922_v31  ;;  %v1937_v45 = vpop.permute.xlu2 %1936 }
 0x29e   : > { %v1939_v55 = vunpack.i.h.bf16 %v1937_v45  ;;  %v1938_v56 = vunpack.i.l.bf16 %v1937_v45 }
 0x29f   : > { %v1073_v38 = vsel %vm1015_vm6, %v1923_v37, %v1924_v36  ;;  %v1097_v39 = vsel %vm1040_vm7, %v1933_v33, %v1934_v32 }
 0x2a0   : > { %1156 = vmatpush.msrb.mxu1 %v1073_v38  ;;  %1191 = vmatpush.msrb.mxu2 %v1097_v39  ;;  %v1019_v4 = vsel %vm1015_vm6, %v1938_v56, %v1939_v55 }
 0x2a1   : > { %1233 = vmatpush.msra.mxu0 %v1097_v39  ;;  %1771 = vmatmul.msk.f32.vlgmr.msrb.gmra.mxu2 %vm1123_vm8, %v2458_v40 }
 0x2a2   : > { %1774 = vmatpush.msk.msra.mxu2 %vm2341_vm5, %v2366_v34  ;;  %1764 = vmatpush.msk.msrb.mxu1 %vm2341_vm5, %v2366_v34  ;;  %v1889_v34 = vunpack.i.h.bf16 %v2445_v2 }
 0x2a3   : > { %1234 = vmatpush.msra.mxu0 %v1076_v17  ;;  %v1279_v17 = vld [vmem:[%s2783_s10 + $0x8] sm:$0xff] }
 0x2a4   : > { %1776 = vmatpush.msk.msra.mxu2 %vm2341_vm5, %v2358_v30  ;;  %1766 = vmatpush.msk.msrb.mxu1 %vm2341_vm5, %v2358_v30  ;;  %v2488_v30 = vld [vmem:[%s2819_s4 + $0x28] sm:$0xff]  ;;  %v1043_v52 = vsel %vm1040_vm7, %v1888_v46, %v1889_v34  ;;  %v1942_v54 = vpop.permute.xlu0 %1941  ;;  %v1947_v60 = vpop.permute.xlu1 %1946 }
 0x2a5   : > { %1235 = vmatpush.msra.mxu0 %v1075_v20  ;;  %v1944_v61 = vunpack.i.h.bf16 %v1942_v54  ;;  %v1943_v62 = vunpack.i.l.bf16 %v1942_v54  ;;  %v1952_v1 = vpop.permute.xlu2 %1951  ;;  %v1949_v2 = vunpack.i.h.bf16 %v1947_v60  ;;  %v1948_v3 = vunpack.i.l.bf16 %v1947_v60 }
 0x2a6   : > { %1778 = vmatpush.msk.msra.mxu2 %vm2341_vm5, %v2332_v22  ;;  %1768 = vmatpush.msk.msrb.mxu1 %vm2341_vm5, %v2332_v22  ;;  %v1044_v22 = vsel %vm1040_vm7, %v1893_v44, %v1894_v41  ;;  %v1954_v7 = vunpack.i.h.bf16 %v1952_v1  ;;  %v1953_v8 = vunpack.i.l.bf16 %v1952_v1 }
 0x2a7   : > { %1236 = vmatpush.msra.mxu0 %v1074_v25  ;;  %v1018_v9 = vsel %vm1015_vm6, %v1943_v62, %v1944_v61  ;;  %v1017_v11 = vsel %vm1015_vm6, %v1948_v3, %v1949_v2 }
 0x2a8   : > { %1780 = vmatpush.msk.msra.mxu2 %vm2341_vm5, %v2387_v43  ;;  %1770 = vmatpush.msk.msrb.mxu1 %vm2341_vm5, %v2387_v43  ;;  %v1293_v43 = vld [vmem:[%s2783_s10 + $0x78] sm:$0xff]  ;;  %v1016_v13 = vsel %vm1015_vm6, %v1953_v8, %v1954_v7 }
 0x2a9   : > { %1237 = vmatpush.msra.mxu0 %v1073_v38  ;;  %1772 = vmatmul.msk.f32.gmra.mxu2 %vm1123_vm8, %v2488_v30 }
 0x2aa   : > { %1203 = vmatpush.msra.mxu2 %v1044_v22  ;;  %1161 = vmatpush.msrb.mxu1 %v1044_v22 }
 0x2ab   : > { %1238 = vmatmul.f32.vlgmr.msra.gmra.mxu0 %v1106_v49  ;;  %1294 = vmatpush.msrb.mxu3 %v1293_v43 }
 0x2ac   : > { %1204 = vmatpush.msra.mxu2 %v1043_v52  ;;  %1162 = vmatpush.msrb.mxu1 %v1043_v52  ;;  %v1116_v26 = vpop.permute.xlu0 %1115  ;;  %v1121_v39 = vpop.permute.xlu1 %1120 }
 0x2ad   : > { %1260 = vmatpush.msrb.mxu0 %v2064_v42  ;;  %1295 = vmatpush.msrb.mxu3 %v1292_v58 }
 0x2ae   : > { %1205 = vmatpush.msra.mxu2 %v1042_v57  ;;  %1163 = vmatpush.msrb.mxu1 %v1042_v57 }
 0x2af   : > { %1296 = vmatpush.msrb.mxu3 %v1291_v0 }
 0x2b0   : > { %1206 = vmatpush.msra.mxu2 %v1041_v63  ;;  %1164 = vmatpush.msrb.mxu1 %v1041_v63 }
 0x2b1   : > { %1297 = vmatpush.msrb.mxu3 %v1290_v6 }
 0x2b2   : > { %1207 = vmatpush.msra.mxu2 %v1019_v4  ;;  %1165 = vmatpush.msrb.mxu1 %v1019_v4 }
 0x2b3   : > { %1241 = vmatmul.f32.gmra.mxu0 %v1109_v5  ;;  %1298 = vmatpush.msrb.mxu3 %v1289_v10  ;;  %v1373_v10 = vld [vmem:[%s2780_s7] sm:$0xf] }
 0x2b4   : > { %1208 = vmatpush.msra.mxu2 %v1018_v9  ;;  %1166 = vmatpush.msrb.mxu1 %v1018_v9 }
 0x2b5   : > { %1299 = vmatpush.msrb.mxu3 %v1288_v12 }
 0x2b6   : > { %1209 = vmatpush.msra.mxu2 %v1017_v11  ;;  %1167 = vmatpush.msrb.mxu1 %v1017_v11 }
 0x2b7   : > { %1300 = vmatpush.msrb.mxu3 %v1287_v14 }
 0x2b8   : > { %1210 = vmatpush.msra.mxu2 %v1016_v13  ;;  %1168 = vmatpush.msrb.mxu1 %v1016_v13 }
 0x2b9   : > { %1169 = vmatmul.f32.vlgmr.msrb.gmra.mxu1 %v1106_v49  ;;  %1301 = vmatpush.msrb.mxu3 %v1286_v15 }
 0x2ba   : > { %1782 = vmatpush.msk.msra.mxu2 %vm2341_vm5, %v2345_v28  ;;  %v1284_v28 = vld [vmem:[%s2783_s10 + $0x30] sm:$0xff] }
 0x2bb   : > { %1789 = vmatmul.msk.f32.vlgmr.msrb.gmra.mxu0 %vm1123_vm8, %v2458_v40  ;;  %1302 = vmatpush.msrb.mxu3 %v1285_v16 }
 0x2bc   : > { %1784 = vmatpush.msk.msra.mxu2 %vm2341_vm5, %v2330_v23  ;;  %v1283_v23 = vld [vmem:[%s2783_s10 + $0x28] sm:$0xff] }
 0x2bd   : > { %1303 = vmatpush.msrb.mxu3 %v1284_v28 }
 0x2be   : > { %1786 = vmatpush.msk.msra.mxu2 %vm2341_vm5, %v2353_v29  ;;  %v1147_v29 = vpop.f32.mrf.mxu0 }
 0x2bf   : > { %1304 = vmatpush.msrb.mxu3 %v1283_v23  ;;  %v1148_v31 = vadd.f32 %v1147_v29, %v1116_v26  ;;  %v1372_v29 = vld [vmem:[%s2779_s6] sm:$0xf] }
 0x2c0   : > { %1788 = vmatpush.msk.msra.mxu2 %vm2341_vm5, %v2368_v35  ;;  %v1281_v35 = vld [vmem:[%s2783_s10 + $0x18] sm:$0xff] }
 0x2c1   : > { %1215 = vmatmul.f32.vlgmr.msra.gmra.mxu2 %v2418_v53  ;;  %1172 = vmatmul.f32.gmra.mxu1 %v1109_v5  ;;  %v1280_v53 = vld [vmem:[%s2783_s10 + $0x10] sm:$0xff] }
 0x2c2   : > { %1305 = vmatpush.msrb.mxu3 %v1282_v27 }
 0x2c3   : > { %1790 = vmatmul.msk.f32.gmra.mxu0 %vm1123_vm8, %v2488_v30 }
 0x2c4   : > { %1306 = vmatpush.msrb.mxu3 %v1281_v35 }
 0x2c6   : > { %1307 = vmatpush.msrb.mxu3 %v1280_v53 }
 0x2c8   : > { %1308 = vmatpush.msrb.mxu3 %v1279_v17 }
 0x2c9   : > { %1218 = vmatmul.f32.gmra.mxu2 %v2436_v59  ;;  %v1150_v59 = vpop.f32.mrf.mxu0 }
 0x2ca   : > { %1309 = vmatpush.msrb.mxu3 %v1278_v18  ;;  %v1151_v41 = vadd.f32 %v1150_v59, %v1121_v39 }
 0x324   : > { %v1193_v19 = vpop.f32.mrf.mxu2 }
 0x328   : > { %v1239_v20 = vpop.f32.mrf.mxu0 }
 0x32c   : > { %v1196_v21 = vpop.f32.mrf.mxu2 }
 0x330   : > { %v1242_v24 = vpop.f32.mrf.mxu0 }
 0x336   : > { %v1170_v25 = vpop.f32.mrf.mxu1 }
 0x337   : > { %v1171_v32 = vadd.f32 %v1170_v25, %v1148_v31  ;;  %v1489_v25 = vld [vmem:[#allocation2] sm:$0x1]  ;;  %v1444_v31 = vld [vmem:[%s2784_s11 + $0x38] sm:$0xff] }
 0x338   : > { %v1262_v36 = vpop.f32.mrf.mxu0 }
 0x339   : > { %v1194_v37 = vadd.f32 %v1193_v19, %v1171_v32  ;;  %v1443_v32 = vld [vmem:[%s2784_s11 + $0x30] sm:$0xff] }
 0x33b   : > { %v1268_v45 = vmul.f32 0.05, %v1194_v37 }
 0x33d   : > { %v1272_v48 = vmax.f32 %v1194_v37, %v1268_v45  ;;  %v1440_v37 = vld [vmem:[%s2784_s11 + $0x18] sm:$0xff] }
 0x33e   : > { %v1173_v40 = vpop.f32.mrf.mxu1 }
 0x33f   : > { %v1174_v34 = vadd.f32 %v1173_v40, %v1151_v41  ;;  %v1437_v40 = vld [vmem:[%s2784_s11] sm:$0xff] }
 0x340   : > { %v1265_v51 = vpop.f32.mrf.mxu0 }
 0x341   : > { %v1197_v22 = vadd.f32 %v1196_v21, %v1174_v34 }
 0x343   : > { %v1270_v54 = vmul.f32 0.05, %v1197_v22 }
 0x344   : > { %v1216_v33 = vpop.f32.mrf.mxu2 }
 0x345   : > { %v1217_v38 = vadd.f32 %v1216_v33, %v1116_v26  ;;  %v1274_v58 = vmax.f32 %v1197_v22, %v1270_v54  ;;  %v1445_v26 = vld [vmem:[%s2784_s11 + $0x40] sm:$0x1]  ;;  %v1442_v33 = vld [vmem:[%s2784_s11 + $0x28] sm:$0xff]  ;;  %v1529_v54 = vld [vmem:[%s2785_s12 + $0x10] sm:$0xff] }
 0x346   : > { %1801 = vmatpush.msk.msra.mxu1 %vm728_vm0, %v1445_v26  ;;  %v1627_v26 = vld [vmem:[%s2790_s17 + $0x10] sm:$0xff]  ;;  %vm1657_vm0 = vcmask 16384  }
 0x347   : > { %v1240_v44 = vadd.f32 %v1239_v20, %v1217_v38  ;;  %v1439_v38 = vld [vmem:[%s2784_s11 + $0x10] sm:$0xff] }
 0x348   : > { %1460 = vmatpush.msra.mxu1 %v1444_v31  ;;  %v1626_v31 = vld [vmem:[%s2790_s17 + $0x8] sm:$0xff] }
 0x349   : > { %v1263_v46 = vadd.f32 %v1262_v36, %v1240_v44  ;;  %v1441_v36 = vld [vmem:[%s2784_s11 + $0x20] sm:$0xff] }
 0x34a   : > { %1461 = vmatpush.msra.mxu1 %v1443_v32  ;;  %v1625_v32 = vld [vmem:[%s2790_s17] sm:$0xff] }
 0x34b   : > { %v1269_v30 = vmul.f32 0.05, %v1263_v46 }
 0x34c   : > { %v1219_v47 = vpop.f32.mrf.mxu2  ;;  %1462 = vmatpush.msra.mxu1 %v1442_v33  ;;  %v1603_v33 = vld [vmem:[%s2789_s16] sm:$0x1] }
 0x34d   : > { %v1273_v49 = vmax.f32 %v1263_v46, %v1269_v30  ;;  %v1220_v50 = vadd.f32 %v1219_v47, %v1121_v39  ;;  %v1438_v39 = vld [vmem:[%s2784_s11 + $0x8] sm:$0xff] }
 0x34e   : > { %1463 = vmatpush.msra.mxu1 %v1441_v36 }
 0x34f   : > { %v1243_v52 = vadd.f32 %v1242_v24, %v1220_v50  ;;  %v1276_v43 = vmax.f32 %v1272_v48, %v1273_v49 }
 0x350   : > { %1464 = vmatpush.msra.mxu1 %v1440_v37 }
 0x351   : > { %v1266_v55 = vadd.f32 %v1265_v51, %v1243_v52  ;;  %1310 = vmatmul.f32.vlgmr.msrb.gmra.mxu3 %v1276_v43  ;;  %v1488_v51 = vld [vmem:[%s2781_s8] sm:$0x1]  ;;  %v1530_v43 = vld [vmem:[%s2785_s12 + $0x18] sm:$0xff] }
 0x352   : > { %1465 = vmatpush.msra.mxu1 %v1439_v38 }
 0x353   : > { %v1271_v56 = vmul.f32 0.05, %v1266_v55 }
 0x354   : > { %1466 = vmatpush.msra.mxu1 %v1438_v39  ;;  %v1633_v39 = vld [vmem:[%s2791_s18] sm:$0x1] }
 0x355   : > { %v1275_v57 = vmax.f32 %v1266_v55, %v1271_v56  ;;  %v1528_v55 = vld [vmem:[%s2785_s12 + $0x8] sm:$0xff] }
 0x356   : > { %1467 = vmatpush.msra.mxu1 %v1437_v40 }
 0x357   : > { %v1277_v60 = vmax.f32 %v1274_v58, %v1275_v57 }
 0x359   : > { %1313 = vmatmul.f32.gmra.mxu3 %v1277_v60 }
 0x3d4   : > { %v1311_v61 = vpop.f32.mrf.mxu3 }
 0x3d5   : > { %1319 = vrot.lane.b32.xlu0 %v1311_v61, %s2065_s2 }
 0x3dc   : > { %v1314_v62 = vpop.f32.mrf.mxu3 }
 0x3dd   : > { %1321 = vrot.lane.b32.xlu2 %v1314_v62, %s2065_s2  ;;  %s2070_s2 = smov 112  }
 0x437   : > { %v1322_v63 = vpop.permute.xlu2 %1321 }
 0x438   : > { %v1326_v0 = vmax.f32 %v1314_v62, %v1322_v63  ;;  %v1527_v63 = vld [vmem:[%s2785_s12] sm:$0xff] }
 0x43a   : > { %1331 = vrot.lane.b32.xlu1 %v1326_v0, %s2061_s30 }
 0x447   : > { %v1320_v1 = vpop.permute.xlu0 %1319 }
 0x448   : > { %v1325_v2 = vmax.f32 %v1311_v61, %v1320_v1 }
 0x44a   : > { %1329 = vrot.lane.b32.xlu2 %v1325_v2, %s2061_s30  ;;  %v1560_v2 = vld [vmem:[%s2786_s13 + $0x8] sm:$0xff] }
 0x452   : > { %1357 = vrot.lane.b32.xlu2 %v2064_v42, %s2066_s23 }
 0x4a4   : > { %v1330_v3 = vpop.permute.xlu2 %1329 }
 0x4a5   : > { %v1335_v4 = vsel %vm958_vm4, 0.0, %v1330_v3 }
 0x4a6   : > { %v1338_v5 = vsel %vm1337_vm9, %v1335_v4, 0.0  ;;  %v1559_v4 = vld [vmem:[%s2786_s13] sm:$0xff] }
 0x4a7   : > { %1342 = vrot.lane.b32.xlu1 %v1338_v5, %s2063_s1 }
 0x4ac   : > { %v1332_v6 = vpop.permute.xlu1 %1331  ;;  %v1358_v7 = vpop.permute.xlu2 %1357 }
 0x4ad   : > { %v1336_v8 = vsel %vm958_vm4, 0.0, %v1332_v6  ;;  %1411 = vmatpush.msra.mxu0 %v1358_v7  ;;  %v1368_v15 = vsel %vm1337_vm9, %v1338_v5, %v1358_v7  ;;  %v1601_v6 = vld [vmem:[%s2788_s15 + $0x70] sm:$0xff] }
 0x4ae   : > { %v1339_v9 = vsel %vm1337_vm9, %v1336_v8, 0.0  ;;  %v1599_v8 = vld [vmem:[%s2788_s15 + $0x60] sm:$0xff] }
 0x4af   : > { %1351 = vrot.lane.b32.xlu2 %v1339_v9, %s2066_s23  ;;  %1344 = vrot.lane.b32.xlu0 %v1339_v9, %s2063_s1  ;;  %v1369_v14 = vsel %vm1337_vm9, %v1339_v9, %v1358_v7  ;;  %v1598_v9 = vld [vmem:[%s2788_s15 + $0x58] sm:$0xff]  ;;  %s608_s1 = sand.u32 1, %s2047_s21  }
 0x4b0   : > { %1412 = vmatpush.msra.mxu0 %v1358_v7  ;;  %s1660_s25 = scalar_lea.sflag [#allocation5], %s608_s1 }
 0x4b2   : > { %1413 = vmatpush.msra.mxu0 %v1358_v7 }
 0x4b4   : > { %1414 = vmatpush.msra.mxu0 %v1358_v7 }
 0x509   : > { %v1352_v23 = vpop.permute.xlu2 %1351 }
 0x519   : > { %v1343_v42 = vpop.permute.xlu1 %1342 }
 0x51a   : > { %1353 = vrot.lane.b32.xlu1 %v1343_v42, %s2066_s23  ;;  %v1370_v13 = vsel %vm1337_vm9, %v1343_v42, %v1358_v7  ;;  %v1597_v42 = vld [vmem:[%s2788_s15 + $0x50] sm:$0xff] }
 0x521   : > { %v1345_v11 = vpop.permute.xlu0 %1344 }
 0x522   : > { %v1371_v12 = vsel %vm1337_vm9, %v1345_v11, %v1358_v7  ;;  %1355 = vrot.lane.b32.xlu0 %v1345_v11, %s2066_s23  ;;  %1376 = vperm.xlu1 %1873, %v1373_v10   ;;  %v1600_v7 = vld [vmem:[%s2788_s15 + $0x68] sm:$0xff]  ;;  %v1595_v11 = vld [vmem:[%s2788_s15 + $0x40] sm:$0xff] }
 0x523   : > { %1391 = vmatpush.msrb.mxu2 %v1371_v12  ;;  %v1596_v10 = vld [vmem:[%s2788_s15 + $0x48] sm:$0xff]  ;;  %v1594_v12 = vld [vmem:[%s2788_s15 + $0x38] sm:$0xff] }
 0x525   : > { %1392 = vmatpush.msrb.mxu2 %v1370_v13  ;;  %v1593_v13 = vld [vmem:[%s2788_s15 + $0x30] sm:$0xff] }
 0x527   : > { %1393 = vmatpush.msrb.mxu2 %v1369_v14  ;;  %v1592_v14 = vld [vmem:[%s2788_s15 + $0x28] sm:$0xff] }
 0x529   : > { %1394 = vmatpush.msrb.mxu2 %v1368_v15 }
 0x52a   : > { %1349 = vrot.lane.b32.xlu0 %v1338_v5, %s2066_s23  ;;  %v1602_v5 = vld [vmem:[%s2788_s15 + $0x78] sm:$0xff]  ;;  %s609_s23 = scalar_lea.vmem [#allocation6], %s608_s1 }
 0x52b   : > { %1604 = vmatpush.msrb.mxu1 %v1602_v5  ;;  %s1670_s30 = sshll.u32 %s609_s23, 4  ;;  %s1671_s30 = int_to_ptr.vmem [resolvable:$true] %s1670_s30 }
 0x52d   : > { %1605 = vmatpush.msrb.mxu1 %v1601_v6 }
 0x52f   : > { %1606 = vmatpush.msrb.mxu1 %v1600_v7 }
 0x531   : > { %1607 = vmatpush.msrb.mxu1 %v1599_v8 }
 0x533   : > { %1608 = vmatpush.msrb.mxu1 %v1598_v9 }
 0x535   : > { %1609 = vmatpush.msrb.mxu1 %v1597_v42 }
 0x537   : > { %1610 = vmatpush.msrb.mxu1 %v1596_v10 }
 0x539   : > { %1611 = vmatpush.msrb.mxu1 %v1595_v11 }
 0x53b   : > { %1612 = vmatpush.msrb.mxu1 %v1594_v12 }
 0x53d   : > { %1613 = vmatpush.msrb.mxu1 %v1593_v13 }
 0x53f   : > { %1614 = vmatpush.msrb.mxu1 %v1592_v14 }
 0x58c   : > { %v1354_v28 = vpop.permute.xlu1 %1353 }
 0x594   : > { %v1356_v16 = vpop.permute.xlu0 %1355  ;;  %v1377_v35 = vpop.permute.xlu1 %1376 }
 0x595   : > { %1792 = vmatpush.msk.msrb.mxu2 %vm1791_vm10, %v1356_v16  ;;  %1415 = vmatpush.msra.mxu0 %v1356_v16 }
 0x597   : > { %1794 = vmatpush.msk.msrb.mxu2 %vm1791_vm10, %v1354_v28  ;;  %1416 = vmatpush.msra.mxu0 %v1354_v28  ;;  %v1591_v28 = vld [vmem:[%s2788_s15 + $0x20] sm:$0xff] }
 0x598   : > { %1615 = vmatpush.msrb.mxu1 %v1591_v28 }
 0x599   : > { %1796 = vmatpush.msk.msrb.mxu2 %vm1791_vm10, %v1352_v23  ;;  %1417 = vmatpush.msra.mxu0 %v1352_v23  ;;  %v1590_v23 = vld [vmem:[%s2788_s15 + $0x18] sm:$0xff] }
 0x59a   : > { %1616 = vmatpush.msrb.mxu1 %v1590_v23 }
 0x59c   : > { %v1350_v27 = vpop.permute.xlu0 %1349 }
 0x59d   : > { %1798 = vmatpush.msk.msrb.mxu2 %vm1791_vm10, %v1350_v27  ;;  %1418 = vmatpush.msra.mxu0 %v1350_v27  ;;  %v1588_v27 = vld [vmem:[%s2788_s15 + $0x8] sm:$0xff] }
 0x59e   : > { %1799 = vmatmul.msk.f32.vlgmr.msrb.gmra.mxu2 %vm1379_vm11, %v1372_v29  ;;  %1800 = vmatmul.msk.f32.vlgmr.msra.gmra.mxu0 %vm1379_vm11, %v1372_v29  ;;  %v1589_v29 = vld [vmem:[%s2788_s15 + $0x10] sm:$0xff] }
 0x59f   : > { %1617 = vmatpush.msrb.mxu1 %v1589_v29 }
 0x5a1   : > { %1618 = vmatpush.msrb.mxu1 %v1588_v27 }
 0x61b   : > { %v1420_v53 = vpop.f32.mrf.mxu0 }
 0x61c   : > { %v1421_v59 = vadd.f32 %v1420_v53, %v1377_v35  ;;  %v1632_v53 = vld [vmem:[%s2790_s17 + $0x38] sm:$0xff] }
 0x61d   : > { %1645 = vmatpush.msra.mxu3 %v1632_v53 }
 0x61e   : > { %v1424_v17 = vmul.f32 0.05, %v1421_v59 }
 0x620   : > { %v1426_v19 = vmax.f32 %v1421_v59, %v1424_v17  ;;  %v1631_v59 = vld [vmem:[%s2790_s17 + $0x30] sm:$0xff]  ;;  %v1630_v17 = vld [vmem:[%s2790_s17 + $0x28] sm:$0xff] }
 0x621   : > { %v1400_v20 = vpop.f32.mrf.mxu2  ;;  %1646 = vmatpush.msra.mxu3 %v1631_v59 }
 0x622   : > { %v1401_v18 = vadd.f32 %v1400_v20, %v1377_v35  ;;  %1431 = vrot.lane.b32.xlu0 %v1426_v19, %s2067_s28  ;;  %v1587_v35 = vld [vmem:[%s2788_s15] sm:$0xff] }
 0x623   : > { %1619 = vmatpush.msrb.mxu1 %v1587_v35  ;;  %1647 = vmatpush.msra.mxu3 %v1630_v17  ;;  %v1561_v19 = vld [vmem:[%s2787_s14] sm:$0x1] }
 0x624   : > { %v1423_v21 = vmul.f32 0.05, %v1401_v18 }
 0x626   : > { %v1425_v24 = vmax.f32 %v1401_v18, %v1423_v21 }
 0x628   : > { %1429 = vrot.lane.b32.xlu2 %v1425_v24, %s2067_s28  ;;  %s2069_s28 = smov 32  }
 0x62a   : > { %1492 = vperm.xlu0 %1872, %v1489_v25   ;;  %v1628_v25 = vld [vmem:[%s2790_s17 + $0x18] sm:$0xff] }
 0x682   : > { %v1430_v41 = vpop.permute.xlu2 %1429 }
 0x694   : > { %v1432_v44 = vpop.permute.xlu0 %1431 }
 0x695   : > { %v1434_v45 = vsel %vm1433_vm12, %v1430_v41, %v1432_v44 }
 0x696   : > { %v1436_v34 = vmax.f32 %v1425_v24, %v1434_v45  ;;  %v1629_v24 = vld [vmem:[%s2790_s17 + $0x20] sm:$0xff] }
 0x697   : > { %1648 = vmatpush.msra.mxu3 %v1629_v24 }
 0x698   : > { %1802 = vmatmul.msk.f32.vlgmr.msra.gmra.mxu1 %vm1337_vm9, %v1436_v34 }
 0x699   : > { %1649 = vmatpush.msra.mxu3 %v1628_v25 }
 0x69b   : > { %1650 = vmatpush.msra.mxu3 %v1627_v26 }
 0x69c   : > { %v1493_v56 = vpop.permute.xlu0 %1492 }
 0x69d   : > { %v1495_v57 = vperm.slane %v1493_v56, 0  ;;  %1651 = vmatpush.msra.mxu3 %v1626_v31 }
 0x69f   : > { %1652 = vmatpush.msra.mxu3 %v1625_v32 }
 0x715   : > { %v1469_v46 = vpop.f32.mrf.mxu1 }
 0x716   : > { %1473 = vrot.lane.b32.xlu1 %v1469_v46, %s2068_s3 }
 0x788   : > { %v1474_v30 = vpop.permute.xlu1 %1473 }
 0x789   : > { %v1476_v47 = vmax.f32 %v1469_v46, %v1474_v30 }
 0x78b   : > { %v1478_v48 = vrot.slane %v1476_v47, 4  ;;  %v1482_v22 = vsel %vm1480_vm13, %v1476_v47, 0.0 }
 0x78c   : > { %1484 = vrot.lane.b32.xlu2 %v1482_v22, %s2069_s28 }
 0x78d   : > { %v1481_v49 = vsel %vm1480_vm13, 0.0, %v1478_v48 }
 0x7e6   : > { %v1485_v50 = vpop.permute.xlu2 %1484 }
 0x7e7   : > { %v1487_v52 = vsel %vm1123_vm8, %v1481_v49, %v1485_v50 }
 0x7e8   : > { %1515 = vmatpush.msra.mxu2 %v1487_v52 }
 0x7e9   : > { %1803 = vmatmul.msk.f32.vlgmr.msra.gmra.mxu2 %vm1496_vm14, %v1488_v51 }
 0x7ea   : > { %1546 = vmatpush.msrb.mxu2 %v1530_v43 }
 0x7ec   : > { %1547 = vmatpush.msrb.mxu2 %v1529_v54 }
 0x7ee   : > { %1548 = vmatpush.msrb.mxu2 %v1528_v55 }
 0x7f0   : > { %1549 = vmatpush.msrb.mxu2 %v1527_v63 }
 0x7f2   : > { %1580 = vmatpush.msra.mxu2 %v1560_v2 }
 0x7f4   : > { %1581 = vmatpush.msra.mxu2 %v1559_v4 }
 0x86c   : > { %v1517_v58 = vpop.f32.mrf.mxu2 }
 0x86d   : > { %v1518_v60 = vadd.f32 %v1517_v58, %v1495_v57 }
 0x86f   : > { %v1520_v61 = vmul.f32 0.05, %v1518_v60 }
 0x871   : > { %v1521_v62 = vmax.f32 %v1518_v60, %v1520_v61 }
 0x873   : > { %1523 = vrot.lane.b32.xlu1 %v1521_v62, %s2068_s3  ;;  %s1672_s3 = sshll.u32 %s1668_s27, 4  ;;  %s1673_s3 = int_to_ptr.hbm [resolvable:$true] %s1672_s3 }
 0x874   : > { %s2003_s0 = sshra.s32 %s1673_s3, 4  ;;  %s2004_s0 = int_to_ptr.hbm [resolvable:$true] %s2003_s0 }
 0x875   : > { %s2005_s4 = scalar_lea.hbm %s2004_s0, 1  ;;  %p2010_p3 = scmp.lt.s32.totalorder %s2004_s0, %s2792_s19 }
 0x876   : > { %p2006_p0 = scmp.ne.s32.totalorder %s2004_s0, %s2005_s4  ;;  %p2011_p4 = scmp.lt.s32.totalorder %s2009_s20, %s2005_s4 }
 0x878   : > { %p2007_p1 = pnand %p2006_p0, %p2212_p5  ;;  %p2012_p7 = por %p2011_p4, %p2010_p3 }
 0x87a   : > { %p2008_p2 = pneg %p2007_p1 }
 0x87c   : > { %p2013_p8 = pnand %p2012_p7, %p2008_p2 }
 0x8e5   : > { %v1524_v0 = vpop.permute.xlu1 %1523 }
 0x8e6   : > { %v1526_v1 = vmax.f32 %v1521_v62, %v1524_v0 }
 0x8e8   : > { %1804 = vmatmul.msk.f32.vlgmr.msrb.gmra.mxu2 %vm1123_vm8, %v1526_v1 }
 0x96b   : > { %v1551_v3 = vpop.f32.mrf.mxu2 }
 0x96c   : > { %1555 = vrot.lane.b32.xlu2 %v1551_v3, %s2070_s2 }
 0x9c6   : > { %v1556_v15 = vpop.permute.xlu2 %1555 }
 0x9c7   : > { %v1558_v16 = vmax.f32 %v1551_v3, %v1556_v15 }
 0x9c9   : > { %1805 = vmatmul.msk.f32.vlgmr.msra.gmra.mxu2 %vm1562_vm15, %v1558_v16 }
 0xa4c   : > { %v1583_v20 = vpop.f32.mrf.mxu2 }
 0xa4d   : > { %v1584_v18 = vadd.f32 %v1583_v20, %v1561_v19 }
 0xa4f   : > { %1955 = vtanh.f32 %v1584_v18 }
 0xa55   : > { %v1956_v21 = vpop.eup %1955 }
 0xa56   : > { %1620 = vmatmul.f32.vlgmr.msrb.gmra.mxu1 %v1956_v21 }
 0xad3   : > { %v1621_v36 = vpop.f32.mrf.mxu1 }
 0xad4   : > { %v1622_v37 = vadd.f32 %v1621_v36, %v1603_v33 }
 0xad6   : > { %1957 = vtanh.f32 %v1622_v37 }
 0xadc   : > { %v1958_v38 = vpop.eup %1957 }
 0xadd   : > { %1806 = vmatmul.msk.f32.vlgmr.msra.gmra.mxu3 %vm1379_vm11, %v1958_v38 }
 0xb60   : > { %v1654_v40 = vpop.f32.mrf.mxu3 }
 0xb61   : > { %v1655_v41 = vadd.f32 %v1654_v40, %v1633_v39 }
 0xb63   : > { %1658 = vst.msk [vmem:[%s609_s23] sm:$0x1] %vm1657_vm0, %v1655_v41 }
 0xb64   : > { %2016 = shalt.err (!%p2013_p8)
}
 0xb65   : > { %1813 = dma.vmem_to_hbm [thread:$0]  (%p2212_p5), %s1671_s30, 16, %s1673_s3, %s1660_s25  }
 0xb66 PF: > { %s2820_s1 = sld [smem:[#allocation9_spill]]  ;;  %p1825_p9 = scmp.ge.s32.totalorder %s2055_s22, 2 }
 0xb68   : > { %p1820_p10 = pnand %p1825_p9, %p2216_p6 }
 0xb6a   : > { %p1821_p11 = pneg %p1820_p10 }
 0xb6c   : > { %s1684_s23 = sand.u32 1, %s2820_s1  }
 0xb6d   : > { %s1685_s9 = scalar_lea.sflag [#allocation5], %s1684_s23 }
 0xb6e   : > { %2038 = dma.done.wait (%p1821_p11), %s1685_s9, 16  }
 0xb6f   : > { %2040 = vsyncadd (%p1821_p11), %s1685_s9, 4294967280  ;;  %s2822_s22 = sld [smem:[#allocation11_spill]]  ;;  %s2825_s20 = smov %s2047_s21 }
 0xb70   : > { %s2823_s4 = sld [smem:[#allocation10_spill]] }
 0xb71   : > { %s2824_s1 = sld [smem:[#allocation12_spill]] }
 0xb75   : > { %p32_p12 = scmp.ge.s32.totalorder %s2822_s22, 6  }
 0xb76   : > { %s2826_s21 = smov %s2823_s4 }
 0xb77   :  { %34 = sbr.rel (!%p32_p12) target bundleno = 10 (0xa), region = 136 }
 0xb7c   :  { %1690 = vsyncpa [#allocation4], 1 }
 0xb7d   :  { %1692 = vsyncpa [#allocation4 + $0x1], 1 }
 0xb7e   :  { %1693 = vsyncpa [#allocation5], 1 }
 0xb7f   :  { %1695 = vsyncpa [#allocation5 + $0x1], 1 }

</bundles_post_ra>
